<compile_context>
chip_gen: v6e
topology: v6e:2x2x1
jax: 0.10.0
libtpu: 0.0.40
codegen_flags: <defaults>
</compile_context>

<pallas_src>
import functools
import math

import jax
import jax.numpy as jnp
from jax.experimental import pallas as pl
from jax.experimental.pallas import tpu as pltpu

BN_EPS = 1e-5
LANES = 128


def _round_up(x, m):
    return (x + m - 1) // m * m


def _pad2(w, rows, cols):
    return jnp.pad(w, ((0, rows - w.shape[0]), (0, cols - w.shape[1])))


def _pad1(v, n):
    return jnp.pad(v, (0, n - v.shape[0]))


def _pad_lanes(x, target):
    pad = target - x.shape[-1]
    return x if pad == 0 else jnp.pad(x, ((0, 0), (0, pad)))


# ----------------------------------------------------------------------------
# Fused kernel: entire QNetworkE forward on one VMEM-resident set of tiles.
# Ref layout (19 inputs + 1 output):
#   refs[0]      xp   : [B, P0_in]   padded hist_price                (f32)
#   refs[1]      xe   : [B, P4_in]   padded embed                     (f32)
#   refs[2:11]   w0..8: per-layer padded weights [Pin_l, Pout_l]      (bf16)
#   refs[11:18]  gb0..6: [2, Pout_l] rows = (gamma, beta) per BN layer (f32)
#   refs[18]     bias : [2, P_out] rows = (read_emb bias, final bias)  (f32)
#   refs[19]     out  : [B, P_out]                                     (f32)
# ----------------------------------------------------------------------------
def _qnetwork_kernel(*refs):
    xp_ref, xe_ref = refs[0], refs[1]
    w = refs[2:11]
    gb = refs[11:18]
    bias_ref = refs[18]
    o_ref = refs[19]

    inv_b = 1.0 / xp_ref.shape[0]  # static; exact batch count (no row padding)

    def linear(x, li):
        # bf16 x bf16 MXU matmul, f32 accumulate.  Bias omitted where a BN
        # follows (the mean subtraction cancels it exactly).
        return jnp.dot(x.astype(jnp.bfloat16), w[li][...],
                       preferred_element_type=jnp.float32)

    def bn_relu(y, bi):
        # PyTorch BatchNorm1d train-mode (batch mean, biased variance) with
        # one-pass statistics; normalization folded into one scale/shift FMA.
        s1 = jnp.sum(y, axis=0, keepdims=True)
        s2 = jnp.sum(y * y, axis=0, keepdims=True)
        mean = s1 * inv_b
        var = jnp.maximum(s2 * inv_b - mean * mean, 0.0)
        scale = gb[bi][0:1] * jax.lax.rsqrt(var + BN_EPS)
        shift = gb[bi][1:2] - mean * scale
        return jnp.maximum(y * scale + shift, 0.0)

    # read_price: 4x (Linear[no bias] -> BN -> ReLU)   weights 0..3 / BN 0..3
    p = xp_ref[...]
    for li in range(4):
        p = bn_relu(linear(p, li), li)

    # read_emb: Linear + bias -> ReLU                  weight 4 / bias row 0
    e = jnp.maximum(linear(xe_ref[...], 4) + bias_ref[0:1], 0.0)

    h = p + e  # merge, still in vregs

    # post_net: 3x (Linear[no bias] -> BN -> ReLU)     weights 5..7 / BN 4..6
    for k in range(3):
        h = bn_relu(linear(h, 5 + k), 4 + k)

    # final Linear + bias                              weight 8 / bias row 1
    o_ref[...] = linear(h, 8) + bias_ref[1:2]


# ----------------------------------------------------------------------------
# Parameter construction (PyTorch-style uniform(+-1/sqrt(fan_in))) and packing.
# ----------------------------------------------------------------------------
def init_linear(key, din, dout):
    kw, kb = jax.random.split(key)
    bound = 1.0 / math.sqrt(din)
    w = jax.random.uniform(kw, (din, dout), jnp.float32, -bound, bound)
    b = jax.random.uniform(kb, (dout,), jnp.float32, -bound, bound)
    return {"w": w, "b": b}


def init_bn(dout):
    return {"gamma": jnp.ones((dout,), jnp.float32),
            "beta": jnp.zeros((dout,), jnp.float32)}


def init_qnetwork_params(key, base_dim, emb_size):
    keys = jax.random.split(key, 9)
    return {
        "rp": [
            {**init_linear(keys[0], base_dim * 4, base_dim * 2),
             **init_bn(base_dim * 2)},
            {**init_linear(keys[1], base_dim * 2, base_dim),
             **init_bn(base_dim)},
            {**init_linear(keys[2], base_dim, base_dim // 2),
             **init_bn(base_dim // 2)},
            {**init_linear(keys[3], base_dim // 2, base_dim),
             **init_bn(base_dim)},
        ],
        "re": init_linear(keys[4], emb_size, base_dim),
        "pn": [
            {**init_linear(keys[5], base_dim, base_dim // 2),
             **init_bn(base_dim // 2)},
            {**init_linear(keys[6], base_dim // 2, base_dim // 2),
             **init_bn(base_dim // 2)},
            {**init_linear(keys[7], base_dim // 2, base_dim),
             **init_bn(base_dim)},
            init_linear(keys[8], base_dim, base_dim),
        ],
    }


def pack_params(params):
    """One-time packing (outside jit): pad each weight to its OWN
    (round_up(in,128), round_up(out,128)) shape (bf16), and each BN layer's
    gamma/beta to [2, round_up(out,128)] (f32)."""
    layers = list(params["rp"]) + [params["re"]] + list(params["pn"])
    ws = []
    for l in layers:
        din, dout = l["w"].shape
        pin = _round_up(max(din, LANES), LANES)
        pout = _round_up(max(dout, LANES), LANES)
        ws.append(_pad2(l["w"].astype(jnp.float32), pin, pout
                        ).astype(jnp.bfloat16))

    bn_layers = list(params["rp"]) + list(params["pn"][:3])
    gbs = []
    for l in bn_layers:
        f = _round_up(max(l["gamma"].shape[0], LANES), LANES)
        gbs.append(jnp.stack([_pad1(l["gamma"], f), _pad1(l["beta"], f)]
                             ).astype(jnp.float32))

    f_out = _round_up(max(params["pn"][3]["w"].shape[1], LANES), LANES)
    bias = jnp.stack([_pad1(params["re"]["b"], f_out),
                      _pad1(params["pn"][3]["b"], f_out)]).astype(jnp.float32)
    return {"w": tuple(ws), "gb": tuple(gbs), "bias": bias}


def _vmem_limit_bytes(want_bytes):
    """Generation-aware VMEM limit: enough for this kernel, capped at ~80% of
    the physical per-core VMEM (128 MiB on v5e/v6e, 64 MiB on v7x)."""
    phys = 128 * 1024 * 1024
    try:
        info = pltpu.get_tpu_info()
        phys = int(getattr(info, "vmem_capacity_bytes", phys)) or phys
    except Exception:
        pass
    cap = int(phys * 0.8)
    return max(min(int(want_bytes), cap), 32 * 1024 * 1024)


# ----------------------------------------------------------------------------
# Forward: one pallas_call for the whole network.
# ----------------------------------------------------------------------------
@functools.partial(jax.jit, static_argnames=("out_dim",))
def qnetwork_forward(packed, hist_price, embed, *, out_dim):
    batch = hist_price.shape[0]
    if batch % 8 != 0:
        raise ValueError("batch must be a multiple of 8 (16 preferred for "
                         "full bf16 vreg sublane packing)")

    # Lane-pad inputs to the first-layer / read_emb padded contraction dims.
    # At the production config (base_dim=512, emb_size=1024) both are already
    # 128-multiples, so these pads are no-ops (no extra HBM round trip).
    xp = _pad_lanes(hist_price.astype(jnp.float32), packed["w"][0].shape[0])
    xe = _pad_lanes(embed.astype(jnp.float32), packed["w"][4].shape[0])

    f_out = packed["bias"].shape[1]
    n_inputs = 2 + len(packed["w"]) + len(packed["gb"]) + 1
    vspec = pl.BlockSpec(memory_space=pltpu.MemorySpace.VMEM)

    # Cost estimate from the real per-layer padded shapes.
    flops = sum(2 * batch * w.shape[0] * w.shape[1] for w in packed["w"])
    w_bytes = sum(int(w.size) for w in packed["w"]) * 2
    vec_bytes = (sum(int(g.size) for g in packed["gb"])
                 + int(packed["bias"].size)) * 4
    io_bytes = (int(xp.size) + int(xe.size) + batch * f_out) * 4
    transcendentals = sum(g.shape[1] for g in packed["gb"])

    # VMEM budget: resident params + I/O + a handful of live BxF intermediates.
    max_f = max(max(w.shape[1] for w in packed["w"]),
                xp.shape[1], xe.shape[1])
    act_bytes = 6 * batch * max_f * 4
    vmem_limit = _vmem_limit_bytes(w_bytes + vec_bytes + io_bytes + act_bytes
                                   + (8 << 20))

    out = pl.pallas_call(
        _qnetwork_kernel,
        out_shape=jax.ShapeDtypeStruct((batch, f_out), jnp.float32),
        in_specs=[vspec] * n_inputs,
        out_specs=vspec,
        cost_estimate=pl.CostEstimate(flops=flops,
                                      transcendentals=transcendentals,
                                      bytes_accessed=w_bytes + vec_bytes
                                      + io_bytes),
        compiler_params=pltpu.CompilerParams(vmem_limit_bytes=vmem_limit),
    )(xp, xe, *packed["w"], *packed["gb"], packed["bias"])
    return out[:, :out_dim]


# ----------------------------------------------------------------------------
# Pure-JAX reference (f32, bias everywhere, train-mode BN) for validation.
# ----------------------------------------------------------------------------
def qnetwork_reference(params, hist_price, embed):
    def lin(x, l):
        return x @ l["w"] + l["b"]

    def bn(x, l):
        m = jnp.mean(x, axis=0, keepdims=True)
        v = jnp.mean((x - m) ** 2, axis=0, keepdims=True)
        return (x - m) * jax.lax.rsqrt(v + BN_EPS) * l["gamma"] + l["beta"]

    p = hist_price
    for l in params["rp"]:
        p = jnp.maximum(bn(lin(p, l), l), 0.0)
    e = jnp.maximum(lin(embed, params["re"]), 0.0)
    h = p + e
    for l in params["pn"][:3]:
        h = jnp.maximum(bn(lin(h, l), l), 0.0)
    return lin(h, params["pn"][3])


if __name__ == "__main__":
    # Small shapes consistent with the module structure.
    base_dim = 32
    emb_size = 64
    batch = 16  # multiple of 16: full [16,128] bf16 vreg sublane packing

    key = jax.random.PRNGKey(0)
    k_params, k_price, k_emb = jax.random.split(key, 3)

    params = init_qnetwork_params(k_params, base_dim, emb_size)
    packed = pack_params(params)   # one-time packing, outside jit

    hist_price = jax.random.normal(k_price, (batch, base_dim * 4), jnp.float32)
    embed = jax.random.normal(k_emb, (batch, emb_size), jnp.float32)

    qvalues = qnetwork_forward(packed, hist_price, embed, out_dim=base_dim)
    qvalues = jax.block_until_ready(qvalues)

    assert qvalues.shape == (batch, base_dim), qvalues.shape
    assert jnp.all(jnp.isfinite(qvalues))

    # Validate against the f32 pure-JAX reference (bf16 weights -> loose tol).
    ref = qnetwork_reference(params, hist_price, embed)
    max_err = float(jnp.max(jnp.abs(qvalues - ref)))
    assert jnp.allclose(qvalues, ref, rtol=1e-1, atol=1e-1), max_err

    print("KERNEL_OK")
</pallas_src>

<mosaic_0001>
module attributes {stable_mosaic.version = 11 : i64} {
  func.func @_qnetwork_kernel(%arg0: memref<16x128xf32, #tpu.memory_space<vmem>>, %arg1: memref<16x128xf32, #tpu.memory_space<vmem>>, %arg2: memref<128x128xbf16, #tpu.memory_space<vmem>>, %arg3: memref<128x128xbf16, #tpu.memory_space<vmem>>, %arg4: memref<128x128xbf16, #tpu.memory_space<vmem>>, %arg5: memref<128x128xbf16, #tpu.memory_space<vmem>>, %arg6: memref<128x128xbf16, #tpu.memory_space<vmem>>, %arg7: memref<128x128xbf16, #tpu.memory_space<vmem>>, %arg8: memref<128x128xbf16, #tpu.memory_space<vmem>>, %arg9: memref<128x128xbf16, #tpu.memory_space<vmem>>, %arg10: memref<128x128xbf16, #tpu.memory_space<vmem>>, %arg11: memref<2x128xf32, #tpu.memory_space<vmem>>, %arg12: memref<2x128xf32, #tpu.memory_space<vmem>>, %arg13: memref<2x128xf32, #tpu.memory_space<vmem>>, %arg14: memref<2x128xf32, #tpu.memory_space<vmem>>, %arg15: memref<2x128xf32, #tpu.memory_space<vmem>>, %arg16: memref<2x128xf32, #tpu.memory_space<vmem>>, %arg17: memref<2x128xf32, #tpu.memory_space<vmem>>, %arg18: memref<2x128xf32, #tpu.memory_space<vmem>>, %arg19: memref<16x128xf32, #tpu.memory_space<vmem>>) attributes {dimension_semantics = [], scalar_prefetch = 0 : i64, scratch_operands = 0 : i64, tpu.core_type = #tpu.core_type<tc>} {
    %c0 = arith.constant 0 : index
    %c0_0 = arith.constant 0 : index
    %0 = vector.load %arg0[%c0, %c0_0] : memref<16x128xf32, #tpu.memory_space<vmem>>, vector<16x128xf32>
    %1 = arith.truncf %0 : vector<16x128xf32> to vector<16x128xbf16>
    %c0_1 = arith.constant 0 : index
    %c0_2 = arith.constant 0 : index
    %2 = vector.load %arg2[%c0_1, %c0_2] : memref<128x128xbf16, #tpu.memory_space<vmem>>, vector<128x128xbf16>
    %cst = arith.constant dense<0.000000e+00> : vector<16x128xf32>
    %3 = tpu.matmul %1, %2, %cst {dimension_numbers = #tpu.dot_dimension_numbers<[1], [0], [0], [1], [0, 0, 1, 1], [], []>} : vector<16x128xbf16>, vector<128x128xbf16>, vector<16x128xf32> -> vector<16x128xf32>
    %cst_3 = arith.constant dense<0.000000e+00> : vector<128xf32>
    %4 = vector.multi_reduction <add>, %3, %cst_3 [0] : vector<16x128xf32> to vector<128xf32>
    %5 = vector.shape_cast %4 : vector<128xf32> to vector<1x128xf32>
    %6 = arith.mulf %3, %3 : vector<16x128xf32>
    %cst_4 = arith.constant dense<0.000000e+00> : vector<128xf32>
    %7 = vector.multi_reduction <add>, %6, %cst_4 [0] : vector<16x128xf32> to vector<128xf32>
    %8 = vector.shape_cast %7 : vector<128xf32> to vector<1x128xf32>
    %cst_5 = arith.constant 6.250000e-02 : f32
    %9 = vector.broadcast %cst_5 : f32 to vector<1x128xf32>
    %10 = arith.mulf %5, %9 : vector<1x128xf32>
    %cst_6 = arith.constant 6.250000e-02 : f32
    %11 = vector.broadcast %cst_6 : f32 to vector<1x128xf32>
    %12 = arith.mulf %8, %11 : vector<1x128xf32>
    %13 = arith.mulf %10, %10 : vector<1x128xf32>
    %14 = arith.subf %12, %13 : vector<1x128xf32>
    %cst_7 = arith.constant 0.000000e+00 : f32
    %15 = vector.broadcast %cst_7 : f32 to vector<1x128xf32>
    %16 = arith.maximumf %14, %15 : vector<1x128xf32>
    %c0_8 = arith.constant 0 : index
    %c0_9 = arith.constant 0 : index
    %17 = vector.load %arg11[%c0_8, %c0_9] : memref<2x128xf32, #tpu.memory_space<vmem>>, vector<1x128xf32>
    %cst_10 = arith.constant 9.99999974E-6 : f32
    %18 = vector.broadcast %cst_10 : f32 to vector<1x128xf32>
    %19 = arith.addf %16, %18 : vector<1x128xf32>
    %20 = math.rsqrt %19 : vector<1x128xf32>
    %21 = arith.mulf %17, %20 : vector<1x128xf32>
    %c1 = arith.constant 1 : index
    %c0_11 = arith.constant 0 : index
    %22 = vector.load %arg11[%c1, %c0_11] : memref<2x128xf32, #tpu.memory_space<vmem>>, vector<1x128xf32>
    %23 = arith.mulf %10, %21 : vector<1x128xf32>
    %24 = arith.subf %22, %23 : vector<1x128xf32>
    %25 = vector.broadcast %21 : vector<1x128xf32> to vector<16x128xf32>
    %26 = arith.mulf %3, %25 : vector<16x128xf32>
    %27 = vector.broadcast %24 : vector<1x128xf32> to vector<16x128xf32>
    %28 = arith.addf %26, %27 : vector<16x128xf32>
    %cst_12 = arith.constant 0.000000e+00 : f32
    %29 = vector.broadcast %cst_12 : f32 to vector<16x128xf32>
    %30 = arith.maximumf %28, %29 : vector<16x128xf32>
    %31 = arith.truncf %30 : vector<16x128xf32> to vector<16x128xbf16>
    %c0_13 = arith.constant 0 : index
    %c0_14 = arith.constant 0 : index
    %32 = vector.load %arg3[%c0_13, %c0_14] : memref<128x128xbf16, #tpu.memory_space<vmem>>, vector<128x128xbf16>
    %cst_15 = arith.constant dense<0.000000e+00> : vector<16x128xf32>
    %33 = tpu.matmul %31, %32, %cst_15 {dimension_numbers = #tpu.dot_dimension_numbers<[1], [0], [0], [1], [0, 0, 1, 1], [], []>} : vector<16x128xbf16>, vector<128x128xbf16>, vector<16x128xf32> -> vector<16x128xf32>
    %cst_16 = arith.constant dense<0.000000e+00> : vector<128xf32>
    %34 = vector.multi_reduction <add>, %33, %cst_16 [0] : vector<16x128xf32> to vector<128xf32>
    %35 = vector.shape_cast %34 : vector<128xf32> to vector<1x128xf32>
    %36 = arith.mulf %33, %33 : vector<16x128xf32>
    %cst_17 = arith.constant dense<0.000000e+00> : vector<128xf32>
    %37 = vector.multi_reduction <add>, %36, %cst_17 [0] : vector<16x128xf32> to vector<128xf32>
    %38 = vector.shape_cast %37 : vector<128xf32> to vector<1x128xf32>
    %cst_18 = arith.constant 6.250000e-02 : f32
    %39 = vector.broadcast %cst_18 : f32 to vector<1x128xf32>
    %40 = arith.mulf %35, %39 : vector<1x128xf32>
    %cst_19 = arith.constant 6.250000e-02 : f32
    %41 = vector.broadcast %cst_19 : f32 to vector<1x128xf32>
    %42 = arith.mulf %38, %41 : vector<1x128xf32>
    %43 = arith.mulf %40, %40 : vector<1x128xf32>
    %44 = arith.subf %42, %43 : vector<1x128xf32>
    %cst_20 = arith.constant 0.000000e+00 : f32
    %45 = vector.broadcast %cst_20 : f32 to vector<1x128xf32>
    %46 = arith.maximumf %44, %45 : vector<1x128xf32>
    %c0_21 = arith.constant 0 : index
    %c0_22 = arith.constant 0 : index
    %47 = vector.load %arg12[%c0_21, %c0_22] : memref<2x128xf32, #tpu.memory_space<vmem>>, vector<1x128xf32>
    %cst_23 = arith.constant 9.99999974E-6 : f32
    %48 = vector.broadcast %cst_23 : f32 to vector<1x128xf32>
    %49 = arith.addf %46, %48 : vector<1x128xf32>
    %50 = math.rsqrt %49 : vector<1x128xf32>
    %51 = arith.mulf %47, %50 : vector<1x128xf32>
    %c1_24 = arith.constant 1 : index
    %c0_25 = arith.constant 0 : index
    %52 = vector.load %arg12[%c1_24, %c0_25] : memref<2x128xf32, #tpu.memory_space<vmem>>, vector<1x128xf32>
    %53 = arith.mulf %40, %51 : vector<1x128xf32>
    %54 = arith.subf %52, %53 : vector<1x128xf32>
    %55 = vector.broadcast %51 : vector<1x128xf32> to vector<16x128xf32>
    %56 = arith.mulf %33, %55 : vector<16x128xf32>
    %57 = vector.broadcast %54 : vector<1x128xf32> to vector<16x128xf32>
    %58 = arith.addf %56, %57 : vector<16x128xf32>
    %cst_26 = arith.constant 0.000000e+00 : f32
    %59 = vector.broadcast %cst_26 : f32 to vector<16x128xf32>
    %60 = arith.maximumf %58, %59 : vector<16x128xf32>
    %61 = arith.truncf %60 : vector<16x128xf32> to vector<16x128xbf16>
    %c0_27 = arith.constant 0 : index
    %c0_28 = arith.constant 0 : index
    %62 = vector.load %arg4[%c0_27, %c0_28] : memref<128x128xbf16, #tpu.memory_space<vmem>>, vector<128x128xbf16>
    %cst_29 = arith.constant dense<0.000000e+00> : vector<16x128xf32>
    %63 = tpu.matmul %61, %62, %cst_29 {dimension_numbers = #tpu.dot_dimension_numbers<[1], [0], [0], [1], [0, 0, 1, 1], [], []>} : vector<16x128xbf16>, vector<128x128xbf16>, vector<16x128xf32> -> vector<16x128xf32>
    %cst_30 = arith.constant dense<0.000000e+00> : vector<128xf32>
    %64 = vector.multi_reduction <add>, %63, %cst_30 [0] : vector<16x128xf32> to vector<128xf32>
    %65 = vector.shape_cast %64 : vector<128xf32> to vector<1x128xf32>
    %66 = arith.mulf %63, %63 : vector<16x128xf32>
    %cst_31 = arith.constant dense<0.000000e+00> : vector<128xf32>
    %67 = vector.multi_reduction <add>, %66, %cst_31 [0] : vector<16x128xf32> to vector<128xf32>
    %68 = vector.shape_cast %67 : vector<128xf32> to vector<1x128xf32>
    %cst_32 = arith.constant 6.250000e-02 : f32
    %69 = vector.broadcast %cst_32 : f32 to vector<1x128xf32>
    %70 = arith.mulf %65, %69 : vector<1x128xf32>
    %cst_33 = arith.constant 6.250000e-02 : f32
    %71 = vector.broadcast %cst_33 : f32 to vector<1x128xf32>
    %72 = arith.mulf %68, %71 : vector<1x128xf32>
    %73 = arith.mulf %70, %70 : vector<1x128xf32>
    %74 = arith.subf %72, %73 : vector<1x128xf32>
    %cst_34 = arith.constant 0.000000e+00 : f32
    %75 = vector.broadcast %cst_34 : f32 to vector<1x128xf32>
    %76 = arith.maximumf %74, %75 : vector<1x128xf32>
    %c0_35 = arith.constant 0 : index
    %c0_36 = arith.constant 0 : index
    %77 = vector.load %arg13[%c0_35, %c0_36] : memref<2x128xf32, #tpu.memory_space<vmem>>, vector<1x128xf32>
    %cst_37 = arith.constant 9.99999974E-6 : f32
    %78 = vector.broadcast %cst_37 : f32 to vector<1x128xf32>
    %79 = arith.addf %76, %78 : vector<1x128xf32>
    %80 = math.rsqrt %79 : vector<1x128xf32>
    %81 = arith.mulf %77, %80 : vector<1x128xf32>
    %c1_38 = arith.constant 1 : index
    %c0_39 = arith.constant 0 : index
    %82 = vector.load %arg13[%c1_38, %c0_39] : memref<2x128xf32, #tpu.memory_space<vmem>>, vector<1x128xf32>
    %83 = arith.mulf %70, %81 : vector<1x128xf32>
    %84 = arith.subf %82, %83 : vector<1x128xf32>
    %85 = vector.broadcast %81 : vector<1x128xf32> to vector<16x128xf32>
    %86 = arith.mulf %63, %85 : vector<16x128xf32>
    %87 = vector.broadcast %84 : vector<1x128xf32> to vector<16x128xf32>
    %88 = arith.addf %86, %87 : vector<16x128xf32>
    %cst_40 = arith.constant 0.000000e+00 : f32
    %89 = vector.broadcast %cst_40 : f32 to vector<16x128xf32>
    %90 = arith.maximumf %88, %89 : vector<16x128xf32>
    %91 = arith.truncf %90 : vector<16x128xf32> to vector<16x128xbf16>
    %c0_41 = arith.constant 0 : index
    %c0_42 = arith.constant 0 : index
    %92 = vector.load %arg5[%c0_41, %c0_42] : memref<128x128xbf16, #tpu.memory_space<vmem>>, vector<128x128xbf16>
    %cst_43 = arith.constant dense<0.000000e+00> : vector<16x128xf32>
    %93 = tpu.matmul %91, %92, %cst_43 {dimension_numbers = #tpu.dot_dimension_numbers<[1], [0], [0], [1], [0, 0, 1, 1], [], []>} : vector<16x128xbf16>, vector<128x128xbf16>, vector<16x128xf32> -> vector<16x128xf32>
    %cst_44 = arith.constant dense<0.000000e+00> : vector<128xf32>
    %94 = vector.multi_reduction <add>, %93, %cst_44 [0] : vector<16x128xf32> to vector<128xf32>
    %95 = vector.shape_cast %94 : vector<128xf32> to vector<1x128xf32>
    %96 = arith.mulf %93, %93 : vector<16x128xf32>
    %cst_45 = arith.constant dense<0.000000e+00> : vector<128xf32>
    %97 = vector.multi_reduction <add>, %96, %cst_45 [0] : vector<16x128xf32> to vector<128xf32>
    %98 = vector.shape_cast %97 : vector<128xf32> to vector<1x128xf32>
    %cst_46 = arith.constant 6.250000e-02 : f32
    %99 = vector.broadcast %cst_46 : f32 to vector<1x128xf32>
    %100 = arith.mulf %95, %99 : vector<1x128xf32>
    %cst_47 = arith.constant 6.250000e-02 : f32
    %101 = vector.broadcast %cst_47 : f32 to vector<1x128xf32>
    %102 = arith.mulf %98, %101 : vector<1x128xf32>
    %103 = arith.mulf %100, %100 : vector<1x128xf32>
    %104 = arith.subf %102, %103 : vector<1x128xf32>
    %cst_48 = arith.constant 0.000000e+00 : f32
    %105 = vector.broadcast %cst_48 : f32 to vector<1x128xf32>
    %106 = arith.maximumf %104, %105 : vector<1x128xf32>
    %c0_49 = arith.constant 0 : index
    %c0_50 = arith.constant 0 : index
    %107 = vector.load %arg14[%c0_49, %c0_50] : memref<2x128xf32, #tpu.memory_space<vmem>>, vector<1x128xf32>
    %cst_51 = arith.constant 9.99999974E-6 : f32
    %108 = vector.broadcast %cst_51 : f32 to vector<1x128xf32>
    %109 = arith.addf %106, %108 : vector<1x128xf32>
    %110 = math.rsqrt %109 : vector<1x128xf32>
    %111 = arith.mulf %107, %110 : vector<1x128xf32>
    %c1_52 = arith.constant 1 : index
    %c0_53 = arith.constant 0 : index
    %112 = vector.load %arg14[%c1_52, %c0_53] : memref<2x128xf32, #tpu.memory_space<vmem>>, vector<1x128xf32>
    %113 = arith.mulf %100, %111 : vector<1x128xf32>
    %114 = arith.subf %112, %113 : vector<1x128xf32>
    %115 = vector.broadcast %111 : vector<1x128xf32> to vector<16x128xf32>
    %116 = arith.mulf %93, %115 : vector<16x128xf32>
    %117 = vector.broadcast %114 : vector<1x128xf32> to vector<16x128xf32>
    %118 = arith.addf %116, %117 : vector<16x128xf32>
    %cst_54 = arith.constant 0.000000e+00 : f32
    %119 = vector.broadcast %cst_54 : f32 to vector<16x128xf32>
    %120 = arith.maximumf %118, %119 : vector<16x128xf32>
    %c0_55 = arith.constant 0 : index
    %c0_56 = arith.constant 0 : index
    %121 = vector.load %arg1[%c0_55, %c0_56] : memref<16x128xf32, #tpu.memory_space<vmem>>, vector<16x128xf32>
    %122 = arith.truncf %121 : vector<16x128xf32> to vector<16x128xbf16>
    %c0_57 = arith.constant 0 : index
    %c0_58 = arith.constant 0 : index
    %123 = vector.load %arg6[%c0_57, %c0_58] : memref<128x128xbf16, #tpu.memory_space<vmem>>, vector<128x128xbf16>
    %cst_59 = arith.constant dense<0.000000e+00> : vector<16x128xf32>
    %124 = tpu.matmul %122, %123, %cst_59 {dimension_numbers = #tpu.dot_dimension_numbers<[1], [0], [0], [1], [0, 0, 1, 1], [], []>} : vector<16x128xbf16>, vector<128x128xbf16>, vector<16x128xf32> -> vector<16x128xf32>
    %c0_60 = arith.constant 0 : index
    %c0_61 = arith.constant 0 : index
    %125 = vector.load %arg18[%c0_60, %c0_61] : memref<2x128xf32, #tpu.memory_space<vmem>>, vector<1x128xf32>
    %126 = vector.broadcast %125 : vector<1x128xf32> to vector<16x128xf32>
    %127 = arith.addf %124, %126 : vector<16x128xf32>
    %cst_62 = arith.constant 0.000000e+00 : f32
    %128 = vector.broadcast %cst_62 : f32 to vector<16x128xf32>
    %129 = arith.maximumf %127, %128 : vector<16x128xf32>
    %130 = arith.addf %120, %129 : vector<16x128xf32>
    %131 = arith.truncf %130 : vector<16x128xf32> to vector<16x128xbf16>
    %c0_63 = arith.constant 0 : index
    %c0_64 = arith.constant 0 : index
    %132 = vector.load %arg7[%c0_63, %c0_64] : memref<128x128xbf16, #tpu.memory_space<vmem>>, vector<128x128xbf16>
    %cst_65 = arith.constant dense<0.000000e+00> : vector<16x128xf32>
    %133 = tpu.matmul %131, %132, %cst_65 {dimension_numbers = #tpu.dot_dimension_numbers<[1], [0], [0], [1], [0, 0, 1, 1], [], []>} : vector<16x128xbf16>, vector<128x128xbf16>, vector<16x128xf32> -> vector<16x128xf32>
    %cst_66 = arith.constant dense<0.000000e+00> : vector<128xf32>
    %134 = vector.multi_reduction <add>, %133, %cst_66 [0] : vector<16x128xf32> to vector<128xf32>
    %135 = vector.shape_cast %134 : vector<128xf32> to vector<1x128xf32>
    %136 = arith.mulf %133, %133 : vector<16x128xf32>
    %cst_67 = arith.constant dense<0.000000e+00> : vector<128xf32>
    %137 = vector.multi_reduction <add>, %136, %cst_67 [0] : vector<16x128xf32> to vector<128xf32>
    %138 = vector.shape_cast %137 : vector<128xf32> to vector<1x128xf32>
    %cst_68 = arith.constant 6.250000e-02 : f32
    %139 = vector.broadcast %cst_68 : f32 to vector<1x128xf32>
    %140 = arith.mulf %135, %139 : vector<1x128xf32>
    %cst_69 = arith.constant 6.250000e-02 : f32
    %141 = vector.broadcast %cst_69 : f32 to vector<1x128xf32>
    %142 = arith.mulf %138, %141 : vector<1x128xf32>
    %143 = arith.mulf %140, %140 : vector<1x128xf32>
    %144 = arith.subf %142, %143 : vector<1x128xf32>
    %cst_70 = arith.constant 0.000000e+00 : f32
    %145 = vector.broadcast %cst_70 : f32 to vector<1x128xf32>
    %146 = arith.maximumf %144, %145 : vector<1x128xf32>
    %c0_71 = arith.constant 0 : index
    %c0_72 = arith.constant 0 : index
    %147 = vector.load %arg15[%c0_71, %c0_72] : memref<2x128xf32, #tpu.memory_space<vmem>>, vector<1x128xf32>
    %cst_73 = arith.constant 9.99999974E-6 : f32
    %148 = vector.broadcast %cst_73 : f32 to vector<1x128xf32>
    %149 = arith.addf %146, %148 : vector<1x128xf32>
    %150 = math.rsqrt %149 : vector<1x128xf32>
    %151 = arith.mulf %147, %150 : vector<1x128xf32>
    %c1_74 = arith.constant 1 : index
    %c0_75 = arith.constant 0 : index
    %152 = vector.load %arg15[%c1_74, %c0_75] : memref<2x128xf32, #tpu.memory_space<vmem>>, vector<1x128xf32>
    %153 = arith.mulf %140, %151 : vector<1x128xf32>
    %154 = arith.subf %152, %153 : vector<1x128xf32>
    %155 = vector.broadcast %151 : vector<1x128xf32> to vector<16x128xf32>
    %156 = arith.mulf %133, %155 : vector<16x128xf32>
    %157 = vector.broadcast %154 : vector<1x128xf32> to vector<16x128xf32>
    %158 = arith.addf %156, %157 : vector<16x128xf32>
    %cst_76 = arith.constant 0.000000e+00 : f32
    %159 = vector.broadcast %cst_76 : f32 to vector<16x128xf32>
    %160 = arith.maximumf %158, %159 : vector<16x128xf32>
    %161 = arith.truncf %160 : vector<16x128xf32> to vector<16x128xbf16>
    %c0_77 = arith.constant 0 : index
    %c0_78 = arith.constant 0 : index
    %162 = vector.load %arg8[%c0_77, %c0_78] : memref<128x128xbf16, #tpu.memory_space<vmem>>, vector<128x128xbf16>
    %cst_79 = arith.constant dense<0.000000e+00> : vector<16x128xf32>
    %163 = tpu.matmul %161, %162, %cst_79 {dimension_numbers = #tpu.dot_dimension_numbers<[1], [0], [0], [1], [0, 0, 1, 1], [], []>} : vector<16x128xbf16>, vector<128x128xbf16>, vector<16x128xf32> -> vector<16x128xf32>
    %cst_80 = arith.constant dense<0.000000e+00> : vector<128xf32>
    %164 = vector.multi_reduction <add>, %163, %cst_80 [0] : vector<16x128xf32> to vector<128xf32>
    %165 = vector.shape_cast %164 : vector<128xf32> to vector<1x128xf32>
    %166 = arith.mulf %163, %163 : vector<16x128xf32>
    %cst_81 = arith.constant dense<0.000000e+00> : vector<128xf32>
    %167 = vector.multi_reduction <add>, %166, %cst_81 [0] : vector<16x128xf32> to vector<128xf32>
    %168 = vector.shape_cast %167 : vector<128xf32> to vector<1x128xf32>
    %cst_82 = arith.constant 6.250000e-02 : f32
    %169 = vector.broadcast %cst_82 : f32 to vector<1x128xf32>
    %170 = arith.mulf %165, %169 : vector<1x128xf32>
    %cst_83 = arith.constant 6.250000e-02 : f32
    %171 = vector.broadcast %cst_83 : f32 to vector<1x128xf32>
    %172 = arith.mulf %168, %171 : vector<1x128xf32>
    %173 = arith.mulf %170, %170 : vector<1x128xf32>
    %174 = arith.subf %172, %173 : vector<1x128xf32>
    %cst_84 = arith.constant 0.000000e+00 : f32
    %175 = vector.broadcast %cst_84 : f32 to vector<1x128xf32>
    %176 = arith.maximumf %174, %175 : vector<1x128xf32>
    %c0_85 = arith.constant 0 : index
    %c0_86 = arith.constant 0 : index
    %177 = vector.load %arg16[%c0_85, %c0_86] : memref<2x128xf32, #tpu.memory_space<vmem>>, vector<1x128xf32>
    %cst_87 = arith.constant 9.99999974E-6 : f32
    %178 = vector.broadcast %cst_87 : f32 to vector<1x128xf32>
    %179 = arith.addf %176, %178 : vector<1x128xf32>
    %180 = math.rsqrt %179 : vector<1x128xf32>
    %181 = arith.mulf %177, %180 : vector<1x128xf32>
    %c1_88 = arith.constant 1 : index
    %c0_89 = arith.constant 0 : index
    %182 = vector.load %arg16[%c1_88, %c0_89] : memref<2x128xf32, #tpu.memory_space<vmem>>, vector<1x128xf32>
    %183 = arith.mulf %170, %181 : vector<1x128xf32>
    %184 = arith.subf %182, %183 : vector<1x128xf32>
    %185 = vector.broadcast %181 : vector<1x128xf32> to vector<16x128xf32>
    %186 = arith.mulf %163, %185 : vector<16x128xf32>
    %187 = vector.broadcast %184 : vector<1x128xf32> to vector<16x128xf32>
    %188 = arith.addf %186, %187 : vector<16x128xf32>
    %cst_90 = arith.constant 0.000000e+00 : f32
    %189 = vector.broadcast %cst_90 : f32 to vector<16x128xf32>
    %190 = arith.maximumf %188, %189 : vector<16x128xf32>
    %191 = arith.truncf %190 : vector<16x128xf32> to vector<16x128xbf16>
    %c0_91 = arith.constant 0 : index
    %c0_92 = arith.constant 0 : index
    %192 = vector.load %arg9[%c0_91, %c0_92] : memref<128x128xbf16, #tpu.memory_space<vmem>>, vector<128x128xbf16>
    %cst_93 = arith.constant dense<0.000000e+00> : vector<16x128xf32>
    %193 = tpu.matmul %191, %192, %cst_93 {dimension_numbers = #tpu.dot_dimension_numbers<[1], [0], [0], [1], [0, 0, 1, 1], [], []>} : vector<16x128xbf16>, vector<128x128xbf16>, vector<16x128xf32> -> vector<16x128xf32>
    %cst_94 = arith.constant dense<0.000000e+00> : vector<128xf32>
    %194 = vector.multi_reduction <add>, %193, %cst_94 [0] : vector<16x128xf32> to vector<128xf32>
    %195 = vector.shape_cast %194 : vector<128xf32> to vector<1x128xf32>
    %196 = arith.mulf %193, %193 : vector<16x128xf32>
    %cst_95 = arith.constant dense<0.000000e+00> : vector<128xf32>
    %197 = vector.multi_reduction <add>, %196, %cst_95 [0] : vector<16x128xf32> to vector<128xf32>
    %198 = vector.shape_cast %197 : vector<128xf32> to vector<1x128xf32>
    %cst_96 = arith.constant 6.250000e-02 : f32
    %199 = vector.broadcast %cst_96 : f32 to vector<1x128xf32>
    %200 = arith.mulf %195, %199 : vector<1x128xf32>
    %cst_97 = arith.constant 6.250000e-02 : f32
    %201 = vector.broadcast %cst_97 : f32 to vector<1x128xf32>
    %202 = arith.mulf %198, %201 : vector<1x128xf32>
    %203 = arith.mulf %200, %200 : vector<1x128xf32>
    %204 = arith.subf %202, %203 : vector<1x128xf32>
    %cst_98 = arith.constant 0.000000e+00 : f32
    %205 = vector.broadcast %cst_98 : f32 to vector<1x128xf32>
    %206 = arith.maximumf %204, %205 : vector<1x128xf32>
    %c0_99 = arith.constant 0 : index
    %c0_100 = arith.constant 0 : index
    %207 = vector.load %arg17[%c0_99, %c0_100] : memref<2x128xf32, #tpu.memory_space<vmem>>, vector<1x128xf32>
    %cst_101 = arith.constant 9.99999974E-6 : f32
    %208 = vector.broadcast %cst_101 : f32 to vector<1x128xf32>
    %209 = arith.addf %206, %208 : vector<1x128xf32>
    %210 = math.rsqrt %209 : vector<1x128xf32>
    %211 = arith.mulf %207, %210 : vector<1x128xf32>
    %c1_102 = arith.constant 1 : index
    %c0_103 = arith.constant 0 : index
    %212 = vector.load %arg17[%c1_102, %c0_103] : memref<2x128xf32, #tpu.memory_space<vmem>>, vector<1x128xf32>
    %213 = arith.mulf %200, %211 : vector<1x128xf32>
    %214 = arith.subf %212, %213 : vector<1x128xf32>
    %215 = vector.broadcast %211 : vector<1x128xf32> to vector<16x128xf32>
    %216 = arith.mulf %193, %215 : vector<16x128xf32>
    %217 = vector.broadcast %214 : vector<1x128xf32> to vector<16x128xf32>
    %218 = arith.addf %216, %217 : vector<16x128xf32>
    %cst_104 = arith.constant 0.000000e+00 : f32
    %219 = vector.broadcast %cst_104 : f32 to vector<16x128xf32>
    %220 = arith.maximumf %218, %219 : vector<16x128xf32>
    %221 = arith.truncf %220 : vector<16x128xf32> to vector<16x128xbf16>
    %c0_105 = arith.constant 0 : index
    %c0_106 = arith.constant 0 : index
    %222 = vector.load %arg10[%c0_105, %c0_106] : memref<128x128xbf16, #tpu.memory_space<vmem>>, vector<128x128xbf16>
    %cst_107 = arith.constant dense<0.000000e+00> : vector<16x128xf32>
    %223 = tpu.matmul %221, %222, %cst_107 {dimension_numbers = #tpu.dot_dimension_numbers<[1], [0], [0], [1], [0, 0, 1, 1], [], []>} : vector<16x128xbf16>, vector<128x128xbf16>, vector<16x128xf32> -> vector<16x128xf32>
    %c1_108 = arith.constant 1 : index
    %c0_109 = arith.constant 0 : index
    %224 = vector.load %arg18[%c1_108, %c0_109] : memref<2x128xf32, #tpu.memory_space<vmem>>, vector<1x128xf32>
    %225 = vector.broadcast %224 : vector<1x128xf32> to vector<16x128xf32>
    %226 = arith.addf %223, %225 : vector<16x128xf32>
    %c0_110 = arith.constant 0 : index
    %c0_111 = arith.constant 0 : index
    %227 = vector.load %arg19[%c0_110, %c0_111] : memref<16x128xf32, #tpu.memory_space<vmem>>, vector<16x128xf32>
    tpu.vector_store %arg19[%c0_110, %c0_111], %226 {strides = array<i32>} : memref<16x128xf32, #tpu.memory_space<vmem>>, vector<16x128xf32>,
    return
  }
}

</mosaic_0001>

<bundles_post_ra>
// kernel: qnetwork_forward.1
= control target key start
LH: loop header
LB: loop body
LE: loop exit
PB: predicated region body
PF: predicated region fallthrough
CT: control target
= control target key end

     0   :  { %s2463_s0 = inlined_call_operand.vmem [shape: f32[16,128], index: 0, kind: input, shape index: {}]   ;;  %s2464_s1 = inlined_call_operand.vmem [shape: f32[16,128], index: 1, kind: input, shape index: {}]   ;;  %s2465_s2 = inlined_call_operand.hbm [shape: bf16[128,128], index: 2, kind: input, shape index: {}]   ;;  %s2466_s3 = inlined_call_operand.hbm [shape: bf16[128,128], index: 3, kind: input, shape index: {}]   ;;  %s2467_s4 = inlined_call_operand.hbm [shape: bf16[128,128], index: 4, kind: input, shape index: {}]   ;;  %s2468_s5 = inlined_call_operand.hbm [shape: bf16[128,128], index: 5, kind: input, shape index: {}]   ;;  %s2469_s6 = inlined_call_operand.hbm [shape: bf16[128,128], index: 6, kind: input, shape index: {}]   ;;  %s2470_s7 = inlined_call_operand.hbm [shape: bf16[128,128], index: 7, kind: input, shape index: {}]   ;;  %s2471_s8 = inlined_call_operand.hbm [shape: bf16[128,128], index: 8, kind: input, shape index: {}]   ;;  %s2472_s9 = inlined_call_operand.hbm [shape: bf16[128,128], index: 9, kind: input, shape index: {}]   ;;  %s2473_s10 = inlined_call_operand.hbm [shape: bf16[128,128], index: 10, kind: input, shape index: {}]   ;;  %s2474_s11 = inlined_call_operand.vmem [shape: f32[2,128], index: 11, kind: input, shape index: {}]   ;;  %s2475_s12 = inlined_call_operand.vmem [shape: f32[2,128], index: 12, kind: input, shape index: {}]   ;;  %s2476_s13 = inlined_call_operand.vmem [shape: f32[2,128], index: 13, kind: input, shape index: {}]   ;;  %s2477_s14 = inlined_call_operand.vmem [shape: f32[2,128], index: 14, kind: input, shape index: {}]   ;;  %s2478_s15 = inlined_call_operand.vmem [shape: f32[2,128], index: 15, kind: input, shape index: {}]   ;;  %s2479_s16 = inlined_call_operand.vmem [shape: f32[2,128], index: 16, kind: input, shape index: {}]   ;;  %s2480_s17 = inlined_call_operand.vmem [shape: f32[2,128], index: 17, kind: input, shape index: {}]   ;;  %s2481_s18 = inlined_call_operand.vmem [shape: f32[2,128], index: 18, kind: input, shape index: {}]   ;;  %s2482_s19 = inlined_call_operand.hbm [shape: f32[16,128], index: 19, kind: output, shape index: {}]  }
   0x1   :  { %2485 = sst [smem:[#allocation24_spill]] %s2463_s0 }
   0x2   :  { %2486 = sst [smem:[#allocation25_spill]] %s2464_s1 }
   0x3   :  { %2487 = sst [smem:[#allocation26_spill]] %s2465_s2 }
   0x4   :  { %2488 = sst [smem:[#allocation27_spill]] %s2466_s3 }
   0x5   :  { %24 = vsyncpa [#allocation3], 0 }
   0x6   :  { %25 = vsyncpa [#allocation6], 0 }
   0x7   :  { %26 = vsyncpa [#allocation9], 0 }
   0x8   :  { %27 = vsyncpa [#allocation12], 0 }
   0x9   :  { %28 = vsyncpa [#allocation15], 0 }
   0xa   :  { %29 = vsyncpa [#allocation4], 0  ;;  %s2124_s0 = smov [#allocation5]   ;;  %s2125_s20 = smov [#allocation8]  }
   0xb   :  { %s51_s30 = sshll.u32 %s2124_s0, 4  ;;  %s75_s21 = sshll.u32 %s2125_s20, 4  ;;  %s52_s30 = int_to_ptr.vmem [resolvable:$true] %s51_s30  ;;  %s76_s21 = int_to_ptr.vmem [resolvable:$true] %s75_s21 }
   0xc   :  { %s1920_s1 = scalar_lea.vmem %s52_s30, 1024  ;;  %p1925_p1 = scmp.lt.s32.totalorder %s52_s30, %s52_s30 }
   0xd   :  { %p1921_p0 = scmp.ne.s32.totalorder %s52_s30, %s1920_s1  ;;  %p1926_p2 = scmp.lt.s32.totalorder %s1920_s1, %s1920_s1 }
   0xf   :  { %p1927_p3 = por %p1926_p2, %p1925_p1 }
  0x11   :  { %p1928_p4 = pnand %p1927_p3, %p1921_p0 }
  0x13   :  { %1931 = shalt.err (!%p1928_p4)
}
  0x14   :  { %s2126_s22 = smov 64   ;;  %s2127_s2 = smov 4  }
  0x15   :  { %s2489_s25 = sld [smem:[#allocation27_spill]]  ;;  %s1940_s3 = scalar_lea.vmem %s76_s21, 1024 }
  0x16   :  { %p1941_p5 = scmp.ne.s32.totalorder %s76_s21, %s1940_s3  ;;  %p1945_p6 = scmp.lt.s32.totalorder %s76_s21, %s76_s21 }
  0x17   :  { %p1946_p7 = scmp.lt.s32.totalorder %s1940_s3, %s1940_s3 }
  0x19   :  { %p1947_p8 = por %p1946_p7, %p1945_p6 }
  0x1b   :  { %57 = dma.hbm_to_vmem [thread:$0]  %s2489_s25, 1024, %s52_s30, [#allocation6], %s2126_s22, %s2126_s22, %s2127_s2  }
  0x1c   :  { %p1948_p9 = pnand %p1947_p8, %p1941_p5 }
  0x1e   :  { %1951 = shalt.err (!%p1948_p9)
}
  0x1f   :  { %81 = dma.hbm_to_vmem [thread:$0]  %s2468_s5, 1024, %s76_s21, [#allocation9], %s2126_s22, %s2126_s22, %s2127_s2  }
  0x20   :  { %s2128_s28 = smov [#allocation11]   ;;  %s2129_s0 = smov [#allocation14]  }
  0x21   :  { %s99_s29 = sshll.u32 %s2128_s28, 4  ;;  %s123_s20 = sshll.u32 %s2129_s0, 4  ;;  %s100_s29 = int_to_ptr.vmem [resolvable:$true] %s99_s29  ;;  %s124_s20 = int_to_ptr.vmem [resolvable:$true] %s123_s20 }
  0x22   :  { %s1960_s30 = scalar_lea.vmem %s100_s29, 1024  ;;  %p1965_p11 = scmp.lt.s32.totalorder %s100_s29, %s100_s29 }
  0x23   :  { %p1961_p10 = scmp.ne.s32.totalorder %s100_s29, %s1960_s30  ;;  %p1966_p12 = scmp.lt.s32.totalorder %s1960_s30, %s1960_s30 }
  0x25   :  { %p1967_p13 = por %p1966_p12, %p1965_p11 }
  0x27   :  { %p1968_p0 = pnand %p1967_p13, %p1961_p10 }
  0x29   :  { %1971 = shalt.err (!%p1968_p0)
}
  0x2a   :  { %105 = dma.hbm_to_vmem [thread:$0]  %s2470_s7, 1024, %s100_s29, [#allocation12], %s2126_s22, %s2126_s22, %s2127_s2  }
  0x2b   :  { %s1980_s5 = scalar_lea.vmem %s124_s20, 1024  ;;  %p1985_p2 = scmp.lt.s32.totalorder %s124_s20, %s124_s20 }
  0x2c   :  { %p1981_p1 = scmp.ne.s32.totalorder %s124_s20, %s1980_s5  ;;  %p1986_p3 = scmp.lt.s32.totalorder %s1980_s5, %s1980_s5 }
  0x2e   :  { %p1987_p4 = por %p1986_p3, %p1985_p2 }
  0x30   :  { %p1988_p5 = pnand %p1987_p4, %p1981_p1 }
  0x32   :  { %1991 = shalt.err (!%p1988_p5)
}
  0x33   :  { %129 = dma.hbm_to_vmem [thread:$0]  %s2472_s9, 1024, %s124_s20, [#allocation15], %s2126_s22, %s2126_s22, %s2127_s2  }
  0x34   :  { %s2130_s25 = smov [#allocation2]   ;;  %s2131_s26 = smov [#allocation7]  }
  0x35   :  { %s39_s3 = sshll.u32 %s2130_s25, 4  ;;  %s63_s27 = sshll.u32 %s2131_s26, 4  ;;  %s40_s3 = int_to_ptr.vmem [resolvable:$true] %s39_s3  ;;  %s64_s27 = int_to_ptr.vmem [resolvable:$true] %s63_s27 }
  0x36   :  { %s2000_s7 = scalar_lea.vmem %s40_s3, 1024  ;;  %p2005_p7 = scmp.lt.s32.totalorder %s40_s3, %s40_s3 }
  0x37   :  { %p2001_p6 = scmp.ne.s32.totalorder %s40_s3, %s2000_s7  ;;  %p2006_p8 = scmp.lt.s32.totalorder %s2000_s7, %s2000_s7 }
  0x39   :  { %p2007_p9 = por %p2006_p8, %p2005_p7 }
  0x3b   :  { %p2008_p10 = pnand %p2007_p9, %p2001_p6 }
  0x3d   :  { %2011 = shalt.err (!%p2008_p10)
}
  0x3e   :  { %s2490_s0 = sld [smem:[#allocation26_spill]]  ;;  %s2020_s9 = scalar_lea.vmem %s64_s27, 1024 }
  0x3f   :  { %p2021_p11 = scmp.ne.s32.totalorder %s64_s27, %s2020_s9  ;;  %p2025_p12 = scmp.lt.s32.totalorder %s64_s27, %s64_s27 }
  0x40   :  { %p2026_p13 = scmp.lt.s32.totalorder %s2020_s9, %s2020_s9 }
  0x42   :  { %p2027_p0 = por %p2026_p13, %p2025_p12 }
  0x44   :  { %45 = dma.hbm_to_vmem [thread:$0]  %s2490_s0, 1024, %s40_s3, [#allocation3], %s2126_s22, %s2126_s22, %s2127_s2  }
  0x45   :  { %p2028_p1 = pnand %p2027_p0, %p2021_p11 }
  0x47   :  { %2031 = shalt.err (!%p2028_p1)
}
  0x48   :  { %69 = dma.hbm_to_vmem [thread:$0]  %s2467_s4, 1024, %s64_s27, [#allocation6], %s2126_s22, %s2126_s22, %s2127_s2  }
  0x49   :  { %s2132_s1 = smov [#allocation10]   ;;  %s2133_s5 = smov [#allocation13]  }
  0x4a   :  { %s87_s23 = sshll.u32 %s2132_s1, 4  ;;  %s111_s21 = sshll.u32 %s2133_s5, 4  ;;  %s88_s23 = int_to_ptr.vmem [resolvable:$true] %s87_s23  ;;  %s112_s21 = int_to_ptr.vmem [resolvable:$true] %s111_s21 }
  0x4b   :  { %s2040_s24 = scalar_lea.vmem %s88_s23, 1024  ;;  %p2045_p3 = scmp.lt.s32.totalorder %s88_s23, %s88_s23 }
  0x4c   :  { %p2041_p2 = scmp.ne.s32.totalorder %s88_s23, %s2040_s24  ;;  %p2046_p4 = scmp.lt.s32.totalorder %s2040_s24, %s2040_s24 }
  0x4e   :  { %p2047_p5 = por %p2046_p4, %p2045_p3 }
  0x50   :  { %p2048_p6 = pnand %p2047_p5, %p2041_p2 }
  0x52   :  { %2051 = shalt.err (!%p2048_p6)
}
  0x53   :  { %93 = dma.hbm_to_vmem [thread:$0]  %s2469_s6, 1024, %s88_s23, [#allocation9], %s2126_s22, %s2126_s22, %s2127_s2  }
  0x54   :  { %s2060_s4 = scalar_lea.vmem %s112_s21, 1024  ;;  %p2065_p8 = scmp.lt.s32.totalorder %s112_s21, %s112_s21 }
  0x55   :  { %p2061_p7 = scmp.ne.s32.totalorder %s112_s21, %s2060_s4  ;;  %p2066_p9 = scmp.lt.s32.totalorder %s2060_s4, %s2060_s4 }
  0x57   :  { %p2067_p10 = por %p2066_p9, %p2065_p8 }
  0x59   :  { %p2068_p11 = pnand %p2067_p10, %p2061_p7 }
  0x5b   :  { %2071 = shalt.err (!%p2068_p11)
}
  0x5c   :  { %117 = dma.hbm_to_vmem [thread:$0]  %s2471_s8, 1024, %s112_s21, [#allocation12], %s2126_s22, %s2126_s22, %s2127_s2  }
  0x5d   :  { %s2134_s7 = smov [#allocation16]  }
  0x5e   :  { %s135_s28 = sshll.u32 %s2134_s7, 4  ;;  %s136_s28 = int_to_ptr.vmem [resolvable:$true] %s135_s28 }
  0x5f   :  { %s2080_s29 = scalar_lea.vmem %s136_s28, 1024  ;;  %p2085_p13 = scmp.lt.s32.totalorder %s136_s28, %s136_s28 }
  0x60   :  { %p2081_p12 = scmp.ne.s32.totalorder %s136_s28, %s2080_s29  ;;  %p2086_p0 = scmp.lt.s32.totalorder %s2080_s29, %s2080_s29 }
  0x62   :  { %p2087_p1 = por %p2086_p0, %p2085_p13 }
  0x64   :  { %p2088_p2 = pnand %p2087_p1, %p2081_p12 }
  0x66   :  { %2091 = shalt.err (!%p2088_p2)
}
  0x67   :  { %141 = dma.hbm_to_vmem [thread:$0]  %s2473_s10, 1024, %s136_s28, [#allocation15], %s2126_s22, %s2126_s22, %s2127_s2  }
  0x68   :  { %2112 = dma.done.wait [#allocation3], 1024  }
  0x69   :  { %2113 = vsyncadd [#allocation3], 4294966272 }
  0x6a   :  { %2114 = dma.done.wait [#allocation6], 2048  }
  0x6b   :  { %2115 = vsyncadd [#allocation6], 4294965248 }
  0x6c   :  { %2116 = dma.done.wait [#allocation9], 2048  }
  0x6d   :  { %2117 = vsyncadd [#allocation9], 4294965248 }
  0x6e   :  { %2118 = dma.done.wait [#allocation12], 2048  }
  0x6f   :  { %2119 = vsyncadd [#allocation12], 4294965248 }
  0x70   :  { %2120 = dma.done.wait [#allocation15], 2048  }
  0x71   :  { %2121 = vsyncadd [#allocation15], 4294965248  ;;  %v2135_v0 = vmov 0.0   ;;  %vm2136_vm0 = vmmov 0   ;;  %v1826_v1 = vld [vmem:[#allocation2 + $0x38] sm:$0xff]   ;;  %v1827_v2 = vld [vmem:[#allocation2 + $0x30] sm:$0xff]   ;;  %v322_v46 = vlaneseq }
  0x72   :  { %1630 = vmatprep.subr.bf16.mxu0 %v2135_v0  ;;  %1646 = vmatprep.mubr.msk.bf16.mxu0 %vm2136_vm0, %v2135_v0  ;;  %v1828_v3 = vld [vmem:[#allocation2 + $0x28] sm:$0xff]   ;;  %v1829_v4 = vld [vmem:[#allocation2 + $0x20] sm:$0xff]   ;;  %v1830_v5 = vld [vmem:[#allocation2 + $0x18] sm:$0xff]   ;;  %s2491_s22 = sld [smem:[#allocation24_spill]] }
  0x73   :  { %1650 = vmatprep.subr.bf16.mxu1 %v2135_v0  ;;  %1666 = vmatprep.mubr.msk.bf16.mxu1 %vm2136_vm0, %v2135_v0  ;;  %v1831_v6 = vld [vmem:[#allocation2 + $0x10] sm:$0xff]   ;;  %v1832_v7 = vld [vmem:[#allocation2 + $0x8] sm:$0xff]   ;;  %v1833_v8 = vld [vmem:[#allocation2] sm:$0xff]   ;;  %v323_v47 = vshrl.u32 %v322_v46, 7  ;;  %s2492_s3 = sld [smem:[#allocation25_spill]] }
  0x74   :  { %1631 = vmatpush3.bf16.msra.mxu0 %v1826_v1  ;;  %v1834_v12 = vld [vmem:[#allocation5 + $0x38] sm:$0xff]   ;;  %v1835_v13 = vld [vmem:[#allocation5 + $0x30] sm:$0xff]   ;;  %v1836_v14 = vld [vmem:[#allocation5 + $0x28] sm:$0xff]  }
  0x75   :  { %1632 = vmatprep.subr.bf16.mxu0 %v2135_v0  ;;  %1651 = vmatpush3.bf16.msra.mxu1 %v1834_v12  ;;  %v1837_v15 = vld [vmem:[#allocation5 + $0x20] sm:$0xff]   ;;  %v1838_v16 = vld [vmem:[#allocation5 + $0x18] sm:$0xff]   ;;  %v1839_v17 = vld [vmem:[#allocation5 + $0x10] sm:$0xff]   ;;  %v2327_v49 = vsub.s32 0, %v323_v47 }
  0x76   :  { %1652 = vmatprep.subr.bf16.mxu1 %v2135_v0  ;;  %v1840_v18 = vld [vmem:[#allocation5 + $0x8] sm:$0xff]   ;;  %v1841_v19 = vld [vmem:[#allocation5] sm:$0xff]   ;;  %v1842_v1 = vld [vmem:[#allocation7 + $0x38] sm:$0xff]  }
  0x77   :  { %v315_v48 = vld [vmem:[%s2474_s11] sm:$0x1]  ;;  %v319_v52 = vld [vmem:[%s2474_s11 + $0x1] sm:$0x1] }
  0x78   :  { %1633 = vmatpush3.bf16.msra.mxu0 %v1827_v2  ;;  %v186_v9 = vld [vmem:[%s2491_s22] sm:$0xff]  ;;  %v187_v10 = vld [vmem:[%s2491_s22 + $0x8] sm:$0xff]  ;;  %v1843_v2 = vld [vmem:[#allocation7 + $0x30] sm:$0xff]  }
  0x79   :  { %1634 = vmatprep.subr.bf16.mxu0 %v2135_v0  ;;  %v188_v11 = vpack.c.bf16 %v187_v10, %v186_v9  ;;  %1653 = vmatpush3.bf16.msra.mxu1 %v1835_v13 }
  0x7a   :  { %1654 = vmatprep.subr.bf16.mxu1 %v2135_v0 }
  0x7c   :  { %1635 = vmatpush3.bf16.msra.mxu0 %v1828_v3  ;;  %v1844_v3 = vld [vmem:[#allocation7 + $0x28] sm:$0xff]  }
  0x7d   :  { %1636 = vmatprep.subr.bf16.mxu0 %v2135_v0  ;;  %1655 = vmatpush3.bf16.msra.mxu1 %v1836_v14 }
  0x7e   :  { %1656 = vmatprep.subr.bf16.mxu1 %v2135_v0 }
  0x80   :  { %1637 = vmatpush3.bf16.msra.mxu0 %v1829_v4  ;;  %v1845_v4 = vld [vmem:[#allocation7 + $0x20] sm:$0xff]  }
  0x81   :  { %1638 = vmatprep.subr.bf16.mxu0 %v2135_v0  ;;  %1657 = vmatpush3.bf16.msra.mxu1 %v1837_v15 }
  0x82   :  { %1658 = vmatprep.subr.bf16.mxu1 %v2135_v0 }
  0x84   :  { %1639 = vmatpush3.bf16.msra.mxu0 %v1830_v5  ;;  %v1846_v5 = vld [vmem:[#allocation7 + $0x18] sm:$0xff]  }
  0x85   :  { %1640 = vmatprep.subr.bf16.mxu0 %v2135_v0  ;;  %1659 = vmatpush3.bf16.msra.mxu1 %v1838_v16 }
  0x86   :  { %1660 = vmatprep.subr.bf16.mxu1 %v2135_v0 }
  0x88   :  { %1641 = vmatpush3.bf16.msra.mxu0 %v1831_v6  ;;  %v1847_v6 = vld [vmem:[#allocation7 + $0x10] sm:$0xff]  }
  0x89   :  { %1642 = vmatprep.subr.bf16.mxu0 %v2135_v0  ;;  %1661 = vmatpush3.bf16.msra.mxu1 %v1839_v17 }
  0x8a   :  { %1662 = vmatprep.subr.bf16.mxu1 %v2135_v0 }
  0x8c   :  { %1643 = vmatpush3.bf16.msra.mxu0 %v1832_v7  ;;  %v1848_v7 = vld [vmem:[#allocation7 + $0x8] sm:$0xff]  }
  0x8d   :  { %1644 = vmatprep.subr.bf16.mxu0 %v2135_v0  ;;  %1663 = vmatpush3.bf16.msra.mxu1 %v1840_v18 }
  0x8e   :  { %1664 = vmatprep.subr.bf16.mxu1 %v2135_v0 }
  0x90   :  { %1645 = vmatpush3.bf16.msra.mxu0 %v1833_v8  ;;  %v1849_v8 = vld [vmem:[#allocation7] sm:$0xff]  }
  0x91   :  { %1670 = vmatprep.subr.bf16.mxu0 %v2135_v0  ;;  %1665 = vmatpush3.bf16.msra.mxu1 %v1841_v19 }
  0x92   :  { %1690 = vmatprep.subr.bf16.mxu1 %v2135_v0 }
  0x93   :  { %1647 = vmatmul.mubr.bf16.vlgmr.msra.gmra.mxu0 %v188_v11 }
  0x94   :  { %1686 = vmatprep.mubr.msk.bf16.mxu0 %vm2136_vm0, %v2135_v0  ;;  %1671 = vmatpush3.bf16.msra.mxu0 %v1842_v1  ;;  %v1863_v1 = vld [vmem:[#allocation10 + $0x10] sm:$0xff]  }
  0x95   :  { %1672 = vmatprep.subr.bf16.mxu0 %v2135_v0 }
  0x98   :  { %1673 = vmatpush3.bf16.msra.mxu0 %v1843_v2  ;;  %v1864_v2 = vld [vmem:[#allocation10 + $0x8] sm:$0xff]  }
  0x99   :  { %1674 = vmatprep.subr.bf16.mxu0 %v2135_v0 }
  0x9c   :  { %1675 = vmatpush3.bf16.msra.mxu0 %v1844_v3  ;;  %v1865_v3 = vld [vmem:[#allocation10] sm:$0xff]  }
  0x9d   :  { %1676 = vmatprep.subr.bf16.mxu0 %v2135_v0 }
  0xa0   :  { %1677 = vmatpush3.bf16.msra.mxu0 %v1845_v4  ;;  %v780_v4 = vld [vmem:[%s2492_s3] sm:$0xff] }
  0xa1   :  { %1678 = vmatprep.subr.bf16.mxu0 %v2135_v0 }
  0xa4   :  { %1679 = vmatpush3.bf16.msra.mxu0 %v1846_v5  ;;  %v781_v5 = vld [vmem:[%s2492_s3 + $0x8] sm:$0xff] }
  0xa5   :  { %1680 = vmatprep.subr.bf16.mxu0 %v2135_v0 }
  0xa8   :  { %1681 = vmatpush3.bf16.msra.mxu0 %v1847_v6  ;;  %v782_v6 = vpack.c.bf16 %v781_v5, %v780_v4 }
  0xa9   :  { %1682 = vmatprep.subr.bf16.mxu0 %v2135_v0 }
  0xac   :  { %1683 = vmatpush3.bf16.msra.mxu0 %v1848_v7 }
  0xad   :  { %1684 = vmatprep.subr.bf16.mxu0 %v2135_v0 }
  0xb0   :  { %1685 = vmatpush3.bf16.msra.mxu0 %v1849_v8 }
  0xb1   :  { %1710 = vmatprep.subr.bf16.mxu0 %v2135_v0 }
 0x153   :  { %v287_v20 = vpop.f32.mrf.mxu0 }
 0x154   :  { %v301_v23 = vmul.f32 %v287_v20, %v287_v20 }
 0x155   :  { %v1648_v21 = vpop.f32.mrf.mxu0 }
 0x157   :  { %v290_v22 = vpop.f32.mrf.mxu0 }
 0x158   :  { %v294_v24 = vadd.f32 %v290_v22, %v287_v20  ;;  %v302_v25 = vmul.f32 %v290_v22, %v290_v22 }
 0x159   :  { %v1649_v26 = vpop.f32.mrf.mxu0 }
 0x15a   :  { %v295_v27 = vrot.slane %v294_v24, 4  ;;  %v303_v28 = vadd.f32 %v302_v25, %v301_v23 }
 0x15c   :  { %v296_v29 = vadd.f32 %v295_v27, %v294_v24  ;;  %v304_v30 = vrot.slane %v303_v28, 4 }
 0x15e   :  { %v297_v31 = vrot.slane %v296_v29, 2  ;;  %v305_v32 = vadd.f32 %v304_v30, %v303_v28 }
 0x160   :  { %v298_v33 = vadd.f32 %v297_v31, %v296_v29  ;;  %v306_v34 = vrot.slane %v305_v32, 2 }
 0x162   :  { %v299_v35 = vrot.slane %v298_v33, 1  ;;  %v307_v36 = vadd.f32 %v306_v34, %v305_v32 }
 0x164   :  { %v300_v37 = vadd.f32 %v299_v35, %v298_v33  ;;  %v308_v38 = vrot.slane %v307_v36, 1  ;;  %v463_v35 = vld [vmem:[%s2475_s12] sm:$0x1] }
 0x166   :  { %v309_v39 = vadd.f32 %v308_v38, %v307_v36  ;;  %v310_v40 = vmul.f32 0.0625, %v300_v37  ;;  %v467_v38 = vld [vmem:[%s2475_s12 + $0x1] sm:$0x1] }
 0x168   :  { %v311_v41 = vmul.f32 0.0625, %v309_v39  ;;  %v312_v42 = vmul.f32 %v310_v40, %v310_v40 }
 0x16a   :  { %v313_v43 = vsub.f32 %v311_v41, %v312_v42 }
 0x16c   :  { %v314_v44 = vmax.f32 %v313_v43, 0.0 }
 0x16e   :  { %v316_v45 = vadd.f32 1e-05, %v314_v44 }
 0x170   :  { %1898 = vrsqrt.f32 %v316_v45 }
 0x17d   :  { %v1899_v50 = vpop.eup %1898 }
 0x17e   :  { %v318_v51 = vmul.f32 %v1899_v50, %v315_v48 }
 0x180   :  { %v320_v53 = vmul.f32 %v318_v51, %v310_v40  ;;  %v325_v54 = vrot.slane %v318_v51, %v2327_v49  ;;  %v1850_v51 = vld [vmem:[#allocation8 + $0x38] sm:$0xff]  }
 0x182   :  { %v321_v55 = vsub.f32 %v319_v52, %v320_v53  ;;  %v326_v56 = vmul.f32 %v325_v54, %v287_v20  ;;  %v327_v57 = vmul.f32 %v325_v54, %v290_v22  ;;  %v1851_v52 = vld [vmem:[#allocation8 + $0x30] sm:$0xff]   ;;  %v1852_v53 = vld [vmem:[#allocation8 + $0x28] sm:$0xff]   ;;  %v1853_v54 = vld [vmem:[#allocation8 + $0x20] sm:$0xff]  }
 0x184   :  { %v331_v58 = vrot.slane %v321_v55, %v2327_v49  ;;  %v1854_v55 = vld [vmem:[#allocation8 + $0x18] sm:$0xff]  }
 0x186   :  { %v333_v59 = vadd.f32 %v331_v58, %v327_v57  ;;  %v332_v60 = vadd.f32 %v331_v58, %v326_v56  ;;  %v1855_v56 = vld [vmem:[#allocation8 + $0x10] sm:$0xff]   ;;  %v1856_v57 = vld [vmem:[#allocation8 + $0x8] sm:$0xff]   ;;  %v1857_v58 = vld [vmem:[#allocation8] sm:$0xff]  }
 0x188   :  { %v334_v61 = vmax.f32 %v332_v60, 0.0  ;;  %v335_v62 = vmax.f32 %v333_v59, 0.0  ;;  %v1858_v59 = vld [vmem:[#allocation10 + $0x38] sm:$0xff]   ;;  %v1859_v60 = vld [vmem:[#allocation10 + $0x30] sm:$0xff]  }
 0x18a   :  { %v336_v63 = vpack.c.bf16 %v335_v62, %v334_v61  ;;  %v1860_v61 = vld [vmem:[#allocation10 + $0x28] sm:$0xff]   ;;  %v1861_v62 = vld [vmem:[#allocation10 + $0x20] sm:$0xff]  }
 0x18c   :  { %1667 = vmatmul.mubr.bf16.vlgmr.msra.gmra.mxu1 %v336_v63  ;;  %v1862_v63 = vld [vmem:[#allocation10 + $0x18] sm:$0xff]  }
 0x18d   :  { %1706 = vmatprep.mubr.msk.bf16.mxu1 %vm2136_vm0, %v2135_v0  ;;  %1691 = vmatpush3.bf16.msra.mxu1 %v1850_v51  ;;  %v1868_v51 = vld [vmem:[#allocation11 + $0x28] sm:$0xff]  }
 0x18e   :  { %1692 = vmatprep.subr.bf16.mxu1 %v2135_v0 }
 0x191   :  { %1693 = vmatpush3.bf16.msra.mxu1 %v1851_v52  ;;  %v1869_v52 = vld [vmem:[#allocation11 + $0x20] sm:$0xff]  }
 0x192   :  { %1694 = vmatprep.subr.bf16.mxu1 %v2135_v0 }
 0x195   :  { %1695 = vmatpush3.bf16.msra.mxu1 %v1852_v53 }
 0x196   :  { %1696 = vmatprep.subr.bf16.mxu1 %v2135_v0 }
 0x199   :  { %1697 = vmatpush3.bf16.msra.mxu1 %v1853_v54 }
 0x19a   :  { %1698 = vmatprep.subr.bf16.mxu1 %v2135_v0 }
 0x19d   :  { %1699 = vmatpush3.bf16.msra.mxu1 %v1854_v55  ;;  %v1870_v55 = vld [vmem:[#allocation11 + $0x18] sm:$0xff]  }
 0x19e   :  { %1700 = vmatprep.subr.bf16.mxu1 %v2135_v0 }
 0x1a1   :  { %1701 = vmatpush3.bf16.msra.mxu1 %v1855_v56 }
 0x1a2   :  { %1702 = vmatprep.subr.bf16.mxu1 %v2135_v0 }
 0x1a5   :  { %1703 = vmatpush3.bf16.msra.mxu1 %v1856_v57 }
 0x1a6   :  { %1704 = vmatprep.subr.bf16.mxu1 %v2135_v0 }
 0x1a9   :  { %1705 = vmatpush3.bf16.msra.mxu1 %v1857_v58  ;;  %v1871_v58 = vld [vmem:[#allocation11 + $0x10] sm:$0xff]  }
 0x1aa   :  { %1730 = vmatprep.subr.bf16.mxu1 %v2135_v0 }
 0x24c   :  { %v435_v9 = vpop.f32.mrf.mxu1 }
 0x24d   :  { %v449_v12 = vmul.f32 %v435_v9, %v435_v9 }
 0x24e   :  { %v1668_v10 = vpop.f32.mrf.mxu1 }
 0x250   :  { %v438_v11 = vpop.f32.mrf.mxu1 }
 0x251   :  { %v442_v13 = vadd.f32 %v438_v11, %v435_v9  ;;  %v450_v14 = vmul.f32 %v438_v11, %v438_v11 }
 0x252   :  { %v1669_v15 = vpop.f32.mrf.mxu1 }
 0x253   :  { %v443_v16 = vrot.slane %v442_v13, 4  ;;  %v451_v17 = vadd.f32 %v450_v14, %v449_v12 }
 0x255   :  { %v444_v18 = vadd.f32 %v443_v16, %v442_v13  ;;  %v452_v19 = vrot.slane %v451_v17, 4 }
 0x257   :  { %v445_v20 = vrot.slane %v444_v18, 2  ;;  %v453_v21 = vadd.f32 %v452_v19, %v451_v17 }
 0x259   :  { %v446_v22 = vadd.f32 %v445_v20, %v444_v18  ;;  %v454_v23 = vrot.slane %v453_v21, 2 }
 0x25b   :  { %v447_v24 = vrot.slane %v446_v22, 1  ;;  %v455_v25 = vadd.f32 %v454_v23, %v453_v21 }
 0x25d   :  { %v448_v26 = vadd.f32 %v447_v24, %v446_v22  ;;  %v456_v27 = vrot.slane %v455_v25, 1 }
 0x25f   :  { %v457_v28 = vadd.f32 %v456_v27, %v455_v25  ;;  %v458_v29 = vmul.f32 0.0625, %v448_v26 }
 0x261   :  { %v459_v30 = vmul.f32 0.0625, %v457_v28  ;;  %v460_v31 = vmul.f32 %v458_v29, %v458_v29 }
 0x263   :  { %v461_v32 = vsub.f32 %v459_v30, %v460_v31 }
 0x265   :  { %v462_v33 = vmax.f32 %v461_v32, 0.0 }
 0x267   :  { %v464_v34 = vadd.f32 1e-05, %v462_v33  ;;  %v611_v33 = vld [vmem:[%s2476_s13] sm:$0x1] }
 0x269   :  { %1900 = vrsqrt.f32 %v464_v34 }
 0x276   :  { %v1901_v36 = vpop.eup %1900 }
 0x277   :  { %v466_v37 = vmul.f32 %v1901_v36, %v463_v35  ;;  %v615_v36 = vld [vmem:[%s2476_s13 + $0x1] sm:$0x1] }
 0x279   :  { %v468_v39 = vmul.f32 %v466_v37, %v458_v29  ;;  %v473_v40 = vrot.slane %v466_v37, %v2327_v49 }
 0x27b   :  { %v469_v41 = vsub.f32 %v467_v38, %v468_v39  ;;  %v474_v42 = vmul.f32 %v473_v40, %v435_v9  ;;  %v475_v43 = vmul.f32 %v473_v40, %v438_v11 }
 0x27d   :  { %v479_v44 = vrot.slane %v469_v41, %v2327_v49 }
 0x27f   :  { %v480_v45 = vadd.f32 %v479_v44, %v474_v42  ;;  %v481_v46 = vadd.f32 %v479_v44, %v475_v43 }
 0x281   :  { %v483_v47 = vmax.f32 %v481_v46, 0.0  ;;  %v482_v48 = vmax.f32 %v480_v45, 0.0 }
 0x283   :  { %v484_v50 = vpack.c.bf16 %v483_v47, %v482_v48  ;;  %v1866_v48 = vld [vmem:[#allocation11 + $0x38] sm:$0xff]  }
 0x285   :  { %1687 = vmatmul.mubr.bf16.vlgmr.msra.gmra.mxu0 %v484_v50  ;;  %v1867_v50 = vld [vmem:[#allocation11 + $0x30] sm:$0xff]  }
 0x286   :  { %1726 = vmatprep.mubr.msk.bf16.mxu0 %vm2136_vm0, %v2135_v0  ;;  %1711 = vmatpush3.bf16.msra.mxu0 %v1858_v59  ;;  %v1872_v59 = vld [vmem:[#allocation11 + $0x8] sm:$0xff]  }
 0x287   :  { %1712 = vmatprep.subr.bf16.mxu0 %v2135_v0 }
 0x28a   :  { %1713 = vmatpush3.bf16.msra.mxu0 %v1859_v60  ;;  %v1873_v60 = vld [vmem:[#allocation11] sm:$0xff]  }
 0x28b   :  { %1714 = vmatprep.subr.bf16.mxu0 %v2135_v0 }
 0x28e   :  { %1715 = vmatpush3.bf16.msra.mxu0 %v1860_v61 }
 0x28f   :  { %1716 = vmatprep.subr.bf16.mxu0 %v2135_v0 }
 0x292   :  { %1717 = vmatpush3.bf16.msra.mxu0 %v1861_v62 }
 0x293   :  { %1718 = vmatprep.subr.bf16.mxu0 %v2135_v0 }
 0x296   :  { %1719 = vmatpush3.bf16.msra.mxu0 %v1862_v63 }
 0x297   :  { %1720 = vmatprep.subr.bf16.mxu0 %v2135_v0 }
 0x29a   :  { %1721 = vmatpush3.bf16.msra.mxu0 %v1863_v1 }
 0x29b   :  { %1722 = vmatprep.subr.bf16.mxu0 %v2135_v0 }
 0x29e   :  { %1723 = vmatpush3.bf16.msra.mxu0 %v1864_v2 }
 0x29f   :  { %1724 = vmatprep.subr.bf16.mxu0 %v2135_v0 }
 0x2a2   :  { %1725 = vmatpush3.bf16.msra.mxu0 %v1865_v3 }
 0x2a3   :  { %1750 = vmatprep.subr.bf16.mxu0 %v2135_v0 }
 0x2a5   :  { %1727 = vmatmul.mubr.bf16.vlgmr.msra.gmra.mxu0 %v782_v6 }
 0x2a6   :  { %1766 = vmatprep.mubr.msk.bf16.mxu0 %vm2136_vm0, %v2135_v0 }
 0x345   :  { %v583_v7 = vpop.f32.mrf.mxu0 }
 0x346   :  { %v597_v10 = vmul.f32 %v583_v7, %v583_v7 }
 0x347   :  { %v1688_v8 = vpop.f32.mrf.mxu0 }
 0x349   :  { %v586_v9 = vpop.f32.mrf.mxu0 }
 0x34a   :  { %v590_v11 = vadd.f32 %v586_v9, %v583_v7  ;;  %v598_v12 = vmul.f32 %v586_v9, %v586_v9 }
 0x34b   :  { %v1689_v13 = vpop.f32.mrf.mxu0 }
 0x34c   :  { %v591_v14 = vrot.slane %v590_v11, 4  ;;  %v599_v15 = vadd.f32 %v598_v12, %v597_v10 }
 0x34e   :  { %v592_v16 = vadd.f32 %v591_v14, %v590_v11  ;;  %v600_v17 = vrot.slane %v599_v15, 4 }
 0x350   :  { %v593_v18 = vrot.slane %v592_v16, 2  ;;  %v601_v19 = vadd.f32 %v600_v17, %v599_v15 }
 0x352   :  { %v594_v20 = vadd.f32 %v593_v18, %v592_v16  ;;  %v602_v21 = vrot.slane %v601_v19, 2 }
 0x354   :  { %v595_v22 = vrot.slane %v594_v20, 1  ;;  %v603_v23 = vadd.f32 %v602_v21, %v601_v19 }
 0x356   :  { %v596_v24 = vadd.f32 %v595_v22, %v594_v20  ;;  %v604_v25 = vrot.slane %v603_v23, 1 }
 0x358   :  { %v605_v26 = vadd.f32 %v604_v25, %v603_v23  ;;  %v606_v27 = vmul.f32 0.0625, %v596_v24  ;;  %v759_v24 = vld [vmem:[%s2477_s14] sm:$0x1] }
 0x35a   :  { %v607_v28 = vmul.f32 0.0625, %v605_v26  ;;  %v608_v29 = vmul.f32 %v606_v27, %v606_v27 }
 0x35c   :  { %v609_v30 = vsub.f32 %v607_v28, %v608_v29 }
 0x35e   :  { %v610_v31 = vmax.f32 %v609_v30, 0.0  ;;  %v1507_v30 = vld [vmem:[%s2481_s18] ss:$0 sm:$0xff] }
 0x360   :  { %v612_v32 = vadd.f32 1e-05, %v610_v31 }
 0x362   :  { %1902 = vrsqrt.f32 %v612_v32 }
 0x365   :  { %v886_v53 = vpop.f32.mrf.mxu0 }
 0x366   :  { %v887_v32 = vadd.f32 %v1507_v30, %v886_v53  ;;  %v1880_v53 = vld [vmem:[#allocation13 + $0x8] sm:$0xff]  }
 0x367   :  { %v1728_v54 = vpop.f32.mrf.mxu0 }
 0x368   :  { %v1881_v54 = vld [vmem:[#allocation13] sm:$0xff]  }
 0x369   :  { %v889_v56 = vpop.f32.mrf.mxu0 }
 0x36b   :  { %v1729_v57 = vpop.f32.mrf.mxu0 }
 0x36f   :  { %v1903_v34 = vpop.eup %1902 }
 0x370   :  { %v614_v35 = vmul.f32 %v1903_v34, %v611_v33 }
 0x372   :  { %v616_v37 = vmul.f32 %v614_v35, %v606_v27  ;;  %v621_v38 = vrot.slane %v614_v35, %v2327_v49  ;;  %v763_v27 = vld [vmem:[%s2477_s14 + $0x1] sm:$0x1] }
 0x374   :  { %v617_v39 = vsub.f32 %v615_v36, %v616_v37  ;;  %v622_v40 = vmul.f32 %v621_v38, %v583_v7  ;;  %v623_v41 = vmul.f32 %v621_v38, %v586_v9  ;;  %v890_v36 = vadd.f32 %v1507_v30, %v889_v56 }
 0x376   :  { %v627_v42 = vrot.slane %v617_v39, %v2327_v49 }
 0x378   :  { %v628_v43 = vadd.f32 %v627_v42, %v622_v40  ;;  %v629_v44 = vadd.f32 %v627_v42, %v623_v41  ;;  %v893_v40 = vmax.f32 %v887_v32, 0.0  ;;  %v894_v42 = vmax.f32 %v890_v36, 0.0  ;;  %v1885_v36 = vld [vmem:[#allocation14 + $0x20] sm:$0xff]  }
 0x37a   :  { %v631_v45 = vmax.f32 %v629_v44, 0.0  ;;  %v630_v46 = vmax.f32 %v628_v43, 0.0 }
 0x37c   :  { %v632_v47 = vpack.c.bf16 %v631_v45, %v630_v46  ;;  %v1874_v46 = vld [vmem:[#allocation13 + $0x38] sm:$0xff]  }
 0x37d   :  { %1751 = vmatpush3.bf16.msra.mxu0 %v1874_v46 }
 0x37e   :  { %1707 = vmatmul.mubr.bf16.vlgmr.msra.gmra.mxu1 %v632_v47  ;;  %1752 = vmatprep.subr.bf16.mxu0 %v2135_v0  ;;  %v1875_v47 = vld [vmem:[#allocation13 + $0x30] sm:$0xff]  }
 0x37f   :  { %1746 = vmatprep.mubr.msk.bf16.mxu1 %vm2136_vm0, %v2135_v0  ;;  %1731 = vmatpush3.bf16.msra.mxu1 %v1866_v48  ;;  %v1876_v48 = vld [vmem:[#allocation13 + $0x28] sm:$0xff]  }
 0x380   :  { %1732 = vmatprep.subr.bf16.mxu1 %v2135_v0 }
 0x381   :  { %1753 = vmatpush3.bf16.msra.mxu0 %v1875_v47 }
 0x382   :  { %1754 = vmatprep.subr.bf16.mxu0 %v2135_v0 }
 0x383   :  { %1733 = vmatpush3.bf16.msra.mxu1 %v1867_v50  ;;  %v1877_v50 = vld [vmem:[#allocation13 + $0x20] sm:$0xff]  }
 0x384   :  { %1734 = vmatprep.subr.bf16.mxu1 %v2135_v0 }
 0x385   :  { %1755 = vmatpush3.bf16.msra.mxu0 %v1876_v48 }
 0x386   :  { %1756 = vmatprep.subr.bf16.mxu0 %v2135_v0 }
 0x387   :  { %1735 = vmatpush3.bf16.msra.mxu1 %v1868_v51  ;;  %v1878_v51 = vld [vmem:[#allocation13 + $0x18] sm:$0xff]  }
 0x388   :  { %1736 = vmatprep.subr.bf16.mxu1 %v2135_v0 }
 0x389   :  { %1757 = vmatpush3.bf16.msra.mxu0 %v1877_v50 }
 0x38a   :  { %1758 = vmatprep.subr.bf16.mxu0 %v2135_v0 }
 0x38b   :  { %1737 = vmatpush3.bf16.msra.mxu1 %v1869_v52  ;;  %v1879_v52 = vld [vmem:[#allocation13 + $0x10] sm:$0xff]  }
 0x38c   :  { %1738 = vmatprep.subr.bf16.mxu1 %v2135_v0 }
 0x38d   :  { %1759 = vmatpush3.bf16.msra.mxu0 %v1878_v51 }
 0x38e   :  { %1760 = vmatprep.subr.bf16.mxu0 %v2135_v0 }
 0x38f   :  { %1739 = vmatpush3.bf16.msra.mxu1 %v1870_v55 }
 0x390   :  { %1740 = vmatprep.subr.bf16.mxu1 %v2135_v0 }
 0x391   :  { %1761 = vmatpush3.bf16.msra.mxu0 %v1879_v52 }
 0x392   :  { %1762 = vmatprep.subr.bf16.mxu0 %v2135_v0 }
 0x393   :  { %1741 = vmatpush3.bf16.msra.mxu1 %v1871_v58 }
 0x394   :  { %1742 = vmatprep.subr.bf16.mxu1 %v2135_v0 }
 0x395   :  { %1763 = vmatpush3.bf16.msra.mxu0 %v1880_v53 }
 0x396   :  { %1764 = vmatprep.subr.bf16.mxu0 %v2135_v0 }
 0x397   :  { %1743 = vmatpush3.bf16.msra.mxu1 %v1872_v59 }
 0x398   :  { %1744 = vmatprep.subr.bf16.mxu1 %v2135_v0 }
 0x399   :  { %1765 = vmatpush3.bf16.msra.mxu0 %v1881_v54 }
 0x39a   :  { %1790 = vmatprep.subr.bf16.mxu0 %v2135_v0 }
 0x39b   :  { %1745 = vmatpush3.bf16.msra.mxu1 %v1873_v60 }
 0x39c   :  { %1770 = vmatprep.subr.bf16.mxu1 %v2135_v0 }
 0x43e   :  { %v731_v61 = vpop.f32.mrf.mxu1 }
 0x43f   :  { %v745_v1 = vmul.f32 %v731_v61, %v731_v61 }
 0x440   :  { %v1708_v62 = vpop.f32.mrf.mxu1 }
 0x442   :  { %v734_v63 = vpop.f32.mrf.mxu1 }
 0x443   :  { %v738_v2 = vadd.f32 %v734_v63, %v731_v61  ;;  %v746_v3 = vmul.f32 %v734_v63, %v734_v63 }
 0x444   :  { %v1709_v4 = vpop.f32.mrf.mxu1 }
 0x445   :  { %v739_v5 = vrot.slane %v738_v2, 4  ;;  %v747_v6 = vadd.f32 %v746_v3, %v745_v1 }
 0x447   :  { %v740_v7 = vadd.f32 %v739_v5, %v738_v2  ;;  %v748_v8 = vrot.slane %v747_v6, 4 }
 0x449   :  { %v741_v9 = vrot.slane %v740_v7, 2  ;;  %v749_v10 = vadd.f32 %v748_v8, %v747_v6 }
 0x44b   :  { %v742_v11 = vadd.f32 %v741_v9, %v740_v7  ;;  %v750_v12 = vrot.slane %v749_v10, 2 }
 0x44d   :  { %v743_v13 = vrot.slane %v742_v11, 1  ;;  %v751_v14 = vadd.f32 %v750_v12, %v749_v10 }
 0x44f   :  { %v744_v15 = vadd.f32 %v743_v13, %v742_v11  ;;  %v752_v16 = vrot.slane %v751_v14, 1 }
 0x451   :  { %v753_v17 = vadd.f32 %v752_v16, %v751_v14  ;;  %v754_v18 = vmul.f32 0.0625, %v744_v15 }
 0x453   :  { %v755_v19 = vmul.f32 0.0625, %v753_v17  ;;  %v756_v20 = vmul.f32 %v754_v18, %v754_v18 }
 0x455   :  { %v757_v21 = vsub.f32 %v755_v19, %v756_v20 }
 0x457   :  { %v758_v22 = vmax.f32 %v757_v21, 0.0  ;;  %v1028_v21 = vld [vmem:[%s2478_s15 + $0x1] sm:$0x1] }
 0x459   :  { %v760_v23 = vadd.f32 1e-05, %v758_v22 }
 0x45b   :  { %1904 = vrsqrt.f32 %v760_v23 }
 0x468   :  { %v1905_v25 = vpop.eup %1904 }
 0x469   :  { %v762_v26 = vmul.f32 %v1905_v25, %v759_v24 }
 0x46b   :  { %v764_v28 = vmul.f32 %v762_v26, %v754_v18  ;;  %v769_v29 = vrot.slane %v762_v26, %v2327_v49  ;;  %v1024_v18 = vld [vmem:[%s2478_s15] sm:$0x1] }
 0x46d   :  { %v765_v31 = vsub.f32 %v763_v27, %v764_v28  ;;  %v771_v33 = vmul.f32 %v769_v29, %v734_v63  ;;  %v770_v34 = vmul.f32 %v769_v29, %v731_v61 }
 0x46f   :  { %v775_v35 = vrot.slane %v765_v31, %v2327_v49 }
 0x471   :  { %v776_v37 = vadd.f32 %v775_v35, %v770_v34  ;;  %v777_v38 = vadd.f32 %v775_v35, %v771_v33  ;;  %v1882_v33 = vld [vmem:[#allocation14 + $0x38] sm:$0xff]   ;;  %v1883_v34 = vld [vmem:[#allocation14 + $0x30] sm:$0xff]   ;;  %v1884_v35 = vld [vmem:[#allocation14 + $0x28] sm:$0xff]  }
 0x473   :  { %v778_v39 = vmax.f32 %v776_v37, 0.0  ;;  %v779_v41 = vmax.f32 %v777_v38, 0.0  ;;  %v1886_v37 = vld [vmem:[#allocation14 + $0x18] sm:$0xff]   ;;  %v1887_v38 = vld [vmem:[#allocation14 + $0x10] sm:$0xff]  }
 0x475   :  { %v895_v43 = vadd.f32 %v893_v40, %v778_v39  ;;  %v896_v44 = vadd.f32 %v894_v42, %v779_v41  ;;  %v1888_v39 = vld [vmem:[#allocation14 + $0x8] sm:$0xff]   ;;  %v1889_v40 = vld [vmem:[#allocation14] sm:$0xff]  }
 0x477   :  { %v897_v45 = vpack.c.bf16 %v896_v44, %v895_v43 }
 0x479   :  { %1747 = vmatmul.mubr.bf16.vlgmr.msra.gmra.mxu1 %v897_v45 }
 0x47a   :  { %1786 = vmatprep.mubr.msk.bf16.mxu1 %vm2136_vm0, %v2135_v0  ;;  %1771 = vmatpush3.bf16.msra.mxu1 %v1882_v33 }
 0x47b   :  { %1772 = vmatprep.subr.bf16.mxu1 %v2135_v0 }
 0x47e   :  { %1773 = vmatpush3.bf16.msra.mxu1 %v1883_v34 }
 0x47f   :  { %1774 = vmatprep.subr.bf16.mxu1 %v2135_v0 }
 0x482   :  { %1775 = vmatpush3.bf16.msra.mxu1 %v1884_v35 }
 0x483   :  { %1776 = vmatprep.subr.bf16.mxu1 %v2135_v0 }
 0x486   :  { %1777 = vmatpush3.bf16.msra.mxu1 %v1885_v36 }
 0x487   :  { %1778 = vmatprep.subr.bf16.mxu1 %v2135_v0 }
 0x48a   :  { %1779 = vmatpush3.bf16.msra.mxu1 %v1886_v37 }
 0x48b   :  { %1780 = vmatprep.subr.bf16.mxu1 %v2135_v0 }
 0x48e   :  { %1781 = vmatpush3.bf16.msra.mxu1 %v1887_v38 }
 0x48f   :  { %1782 = vmatprep.subr.bf16.mxu1 %v2135_v0 }
 0x492   :  { %1783 = vmatpush3.bf16.msra.mxu1 %v1888_v39 }
 0x493   :  { %1784 = vmatprep.subr.bf16.mxu1 %v2135_v0 }
 0x496   :  { %1785 = vmatpush3.bf16.msra.mxu1 %v1889_v40 }
 0x539   :  { %v996_v55 = vpop.f32.mrf.mxu1 }
 0x53a   :  { %v1010_v58 = vmul.f32 %v996_v55, %v996_v55 }
 0x53b   :  { %v1748_v56 = vpop.f32.mrf.mxu1 }
 0x53d   :  { %v999_v57 = vpop.f32.mrf.mxu1 }
 0x53e   :  { %v1003_v59 = vadd.f32 %v999_v57, %v996_v55  ;;  %v1011_v60 = vmul.f32 %v999_v57, %v999_v57 }
 0x53f   :  { %v1749_v61 = vpop.f32.mrf.mxu1 }
 0x540   :  { %v1004_v62 = vrot.slane %v1003_v59, 4  ;;  %v1012_v63 = vadd.f32 %v1011_v60, %v1010_v58 }
 0x542   :  { %v1005_v1 = vadd.f32 %v1004_v62, %v1003_v59  ;;  %v1013_v2 = vrot.slane %v1012_v63, 4 }
 0x544   :  { %v1006_v3 = vrot.slane %v1005_v1, 2  ;;  %v1014_v4 = vadd.f32 %v1013_v2, %v1012_v63 }
 0x546   :  { %v1007_v5 = vadd.f32 %v1006_v3, %v1005_v1  ;;  %v1015_v6 = vrot.slane %v1014_v4, 2 }
 0x548   :  { %v1008_v7 = vrot.slane %v1007_v5, 1  ;;  %v1016_v8 = vadd.f32 %v1015_v6, %v1014_v4 }
 0x54a   :  { %v1009_v9 = vadd.f32 %v1008_v7, %v1007_v5  ;;  %v1017_v10 = vrot.slane %v1016_v8, 1  ;;  %v1172_v5 = vld [vmem:[%s2479_s16] sm:$0x1] }
 0x54c   :  { %v1018_v11 = vadd.f32 %v1017_v10, %v1016_v8  ;;  %v1019_v12 = vmul.f32 0.0625, %v1009_v9  ;;  %v1176_v8 = vld [vmem:[%s2479_s16 + $0x1] sm:$0x1] }
 0x54e   :  { %v1020_v13 = vmul.f32 0.0625, %v1018_v11  ;;  %v1021_v14 = vmul.f32 %v1019_v12, %v1019_v12 }
 0x550   :  { %v1022_v15 = vsub.f32 %v1020_v13, %v1021_v14 }
 0x552   :  { %v1023_v16 = vmax.f32 %v1022_v15, 0.0 }
 0x554   :  { %v1025_v17 = vadd.f32 1e-05, %v1023_v16 }
 0x556   :  { %1906 = vrsqrt.f32 %v1025_v17 }
 0x563   :  { %v1907_v19 = vpop.eup %1906 }
 0x564   :  { %v1027_v20 = vmul.f32 %v1907_v19, %v1024_v18 }
 0x566   :  { %v1029_v22 = vmul.f32 %v1027_v20, %v1019_v12  ;;  %v1034_v23 = vrot.slane %v1027_v20, %v2327_v49  ;;  %v1890_v20 = vld [vmem:[#allocation16 + $0x38] sm:$0xff]  }
 0x568   :  { %v1030_v24 = vsub.f32 %v1028_v21, %v1029_v22  ;;  %v1035_v25 = vmul.f32 %v1034_v23, %v996_v55  ;;  %v1036_v26 = vmul.f32 %v1034_v23, %v999_v57  ;;  %v1891_v21 = vld [vmem:[#allocation16 + $0x30] sm:$0xff]   ;;  %v1892_v22 = vld [vmem:[#allocation16 + $0x28] sm:$0xff]   ;;  %v1893_v23 = vld [vmem:[#allocation16 + $0x20] sm:$0xff]  }
 0x56a   :  { %v1040_v27 = vrot.slane %v1030_v24, %v2327_v49  ;;  %v1894_v24 = vld [vmem:[#allocation16 + $0x18] sm:$0xff]  }
 0x56c   :  { %v1041_v28 = vadd.f32 %v1040_v27, %v1035_v25  ;;  %v1042_v29 = vadd.f32 %v1040_v27, %v1036_v26  ;;  %v1895_v25 = vld [vmem:[#allocation16 + $0x10] sm:$0xff]   ;;  %v1896_v26 = vld [vmem:[#allocation16 + $0x8] sm:$0xff]   ;;  %v1897_v27 = vld [vmem:[#allocation16] sm:$0xff]  }
 0x56e   :  { %v1044_v30 = vmax.f32 %v1042_v29, 0.0  ;;  %v1043_v31 = vmax.f32 %v1041_v28, 0.0 }
 0x570   :  { %v1045_v32 = vpack.c.bf16 %v1044_v30, %v1043_v31 }
 0x572   :  { %1767 = vmatmul.mubr.bf16.vlgmr.msra.gmra.mxu0 %v1045_v32 }
 0x573   :  { %1806 = vmatprep.mubr.msk.bf16.mxu0 %vm2136_vm0, %v2135_v0  ;;  %1791 = vmatpush3.bf16.msra.mxu0 %v1890_v20 }
 0x574   :  { %1792 = vmatprep.subr.bf16.mxu0 %v2135_v0 }
 0x577   :  { %1793 = vmatpush3.bf16.msra.mxu0 %v1891_v21 }
 0x578   :  { %1794 = vmatprep.subr.bf16.mxu0 %v2135_v0 }
 0x57b   :  { %1795 = vmatpush3.bf16.msra.mxu0 %v1892_v22 }
 0x57c   :  { %1796 = vmatprep.subr.bf16.mxu0 %v2135_v0 }
 0x57f   :  { %1797 = vmatpush3.bf16.msra.mxu0 %v1893_v23 }
 0x580   :  { %1798 = vmatprep.subr.bf16.mxu0 %v2135_v0 }
 0x583   :  { %1799 = vmatpush3.bf16.msra.mxu0 %v1894_v24 }
 0x584   :  { %1800 = vmatprep.subr.bf16.mxu0 %v2135_v0 }
 0x587   :  { %1801 = vmatpush3.bf16.msra.mxu0 %v1895_v25 }
 0x588   :  { %1802 = vmatprep.subr.bf16.mxu0 %v2135_v0 }
 0x58b   :  { %1803 = vmatpush3.bf16.msra.mxu0 %v1896_v26 }
 0x58c   :  { %1804 = vmatprep.subr.bf16.mxu0 %v2135_v0 }
 0x58f   :  { %1805 = vmatpush3.bf16.msra.mxu0 %v1897_v27 }
 0x632   :  { %v1144_v41 = vpop.f32.mrf.mxu0 }
 0x633   :  { %v1158_v44 = vmul.f32 %v1144_v41, %v1144_v41 }
 0x634   :  { %v1768_v42 = vpop.f32.mrf.mxu0 }
 0x636   :  { %v1147_v43 = vpop.f32.mrf.mxu0 }
 0x637   :  { %v1151_v45 = vadd.f32 %v1147_v43, %v1144_v41  ;;  %v1159_v46 = vmul.f32 %v1147_v43, %v1147_v43 }
 0x638   :  { %v1769_v47 = vpop.f32.mrf.mxu0 }
 0x639   :  { %v1152_v48 = vrot.slane %v1151_v45, 4  ;;  %v1160_v50 = vadd.f32 %v1159_v46, %v1158_v44 }
 0x63b   :  { %v1153_v51 = vadd.f32 %v1152_v48, %v1151_v45  ;;  %v1161_v52 = vrot.slane %v1160_v50, 4 }
 0x63d   :  { %v1154_v53 = vrot.slane %v1153_v51, 2  ;;  %v1162_v54 = vadd.f32 %v1161_v52, %v1160_v50 }
 0x63f   :  { %v1155_v55 = vadd.f32 %v1154_v53, %v1153_v51  ;;  %v1163_v56 = vrot.slane %v1162_v54, 2 }
 0x641   :  { %v1156_v57 = vrot.slane %v1155_v55, 1  ;;  %v1164_v58 = vadd.f32 %v1163_v56, %v1162_v54  ;;  %v1320_v54 = vld [vmem:[%s2480_s17] sm:$0x1] }
 0x643   :  { %v1157_v59 = vadd.f32 %v1156_v57, %v1155_v55  ;;  %v1165_v60 = vrot.slane %v1164_v58, 1  ;;  %v1324_v57 = vld [vmem:[%s2480_s17 + $0x1] sm:$0x1]  ;;  %s2137_s17 = smov [#allocation17]  }
 0x644   :  { %s1459_s25 = sshll.u32 %s2137_s17, 4  ;;  %s1460_s25 = int_to_ptr.vmem [resolvable:$true] %s1459_s25 }
 0x645   :  { %v1166_v61 = vadd.f32 %v1165_v60, %v1164_v58  ;;  %v1167_v62 = vmul.f32 0.0625, %v1157_v59  ;;  %s2092_s3 = scalar_lea.vmem %s1460_s25, 256  ;;  %p2097_p4 = scmp.lt.s32.totalorder %s1460_s25, %s1460_s25 }
 0x646   :  { %p2093_p3 = scmp.ne.s32.totalorder %s1460_s25, %s2092_s3  ;;  %p2098_p5 = scmp.lt.s32.totalorder %s2092_s3, %s2092_s3 }
 0x647   :  { %v1168_v63 = vmul.f32 0.0625, %v1166_v61  ;;  %v1169_v1 = vmul.f32 %v1167_v62, %v1167_v62 }
 0x648   :  { %p2099_p6 = por %p2098_p5, %p2097_p4 }
 0x649   :  { %v1170_v2 = vsub.f32 %v1168_v63, %v1169_v1 }
 0x64a   :  { %p2100_p7 = pnand %p2099_p6, %p2093_p3 }
 0x64b   :  { %v1171_v3 = vmax.f32 %v1170_v2, 0.0 }
 0x64d   :  { %v1173_v4 = vadd.f32 1e-05, %v1171_v3 }
 0x64f   :  { %1908 = vrsqrt.f32 %v1173_v4 }
 0x65c   :  { %v1909_v6 = vpop.eup %1908 }
 0x65d   :  { %v1175_v7 = vmul.f32 %v1909_v6, %v1172_v5  ;;  %v1540_v6 = vld [vmem:[%s2481_s18 + $0x1] ss:$0 sm:$0xff] }
 0x65f   :  { %v1177_v9 = vmul.f32 %v1175_v7, %v1167_v62  ;;  %v1182_v10 = vrot.slane %v1175_v7, %v2327_v49 }
 0x661   :  { %v1178_v11 = vsub.f32 %v1176_v8, %v1177_v9  ;;  %v1183_v12 = vmul.f32 %v1182_v10, %v1144_v41  ;;  %v1184_v13 = vmul.f32 %v1182_v10, %v1147_v43 }
 0x663   :  { %v1188_v14 = vrot.slane %v1178_v11, %v2327_v49 }
 0x665   :  { %v1189_v15 = vadd.f32 %v1188_v14, %v1183_v12  ;;  %v1190_v16 = vadd.f32 %v1188_v14, %v1184_v13 }
 0x667   :  { %v1192_v17 = vmax.f32 %v1190_v16, 0.0  ;;  %v1191_v18 = vmax.f32 %v1189_v15, 0.0 }
 0x669   :  { %v1193_v19 = vpack.c.bf16 %v1192_v17, %v1191_v18 }
 0x66b   :  { %1787 = vmatmul.mubr.bf16.vlgmr.msra.gmra.mxu1 %v1193_v19 }
 0x72b   :  { %v1292_v28 = vpop.f32.mrf.mxu1 }
 0x72c   :  { %v1306_v31 = vmul.f32 %v1292_v28, %v1292_v28 }
 0x72d   :  { %v1788_v29 = vpop.f32.mrf.mxu1 }
 0x72f   :  { %v1295_v30 = vpop.f32.mrf.mxu1 }
 0x730   :  { %v1299_v32 = vadd.f32 %v1295_v30, %v1292_v28  ;;  %v1307_v33 = vmul.f32 %v1295_v30, %v1295_v30 }
 0x731   :  { %v1789_v34 = vpop.f32.mrf.mxu1 }
 0x732   :  { %v1300_v35 = vrot.slane %v1299_v32, 4  ;;  %v1308_v36 = vadd.f32 %v1307_v33, %v1306_v31 }
 0x734   :  { %v1301_v37 = vadd.f32 %v1300_v35, %v1299_v32  ;;  %v1309_v38 = vrot.slane %v1308_v36, 4 }
 0x736   :  { %v1302_v39 = vrot.slane %v1301_v37, 2  ;;  %v1310_v40 = vadd.f32 %v1309_v38, %v1308_v36 }
 0x738   :  { %v1303_v41 = vadd.f32 %v1302_v39, %v1301_v37  ;;  %v1311_v42 = vrot.slane %v1310_v40, 2 }
 0x73a   :  { %v1304_v43 = vrot.slane %v1303_v41, 1  ;;  %v1312_v44 = vadd.f32 %v1311_v42, %v1310_v40 }
 0x73c   :  { %v1305_v0 = vadd.f32 %v1304_v43, %v1303_v41  ;;  %v1313_v45 = vrot.slane %v1312_v44, 1 }
 0x73e   :  { %v1314_v46 = vadd.f32 %v1313_v45, %v1312_v44  ;;  %v1315_v47 = vmul.f32 0.0625, %v1305_v0 }
 0x740   :  { %v1316_v48 = vmul.f32 0.0625, %v1314_v46  ;;  %v1317_v50 = vmul.f32 %v1315_v47, %v1315_v47 }
 0x742   :  { %v1318_v51 = vsub.f32 %v1316_v48, %v1317_v50 }
 0x744   :  { %v1319_v52 = vmax.f32 %v1318_v51, 0.0 }
 0x746   :  { %v1321_v53 = vadd.f32 1e-05, %v1319_v52 }
 0x748   :  { %1910 = vrsqrt.f32 %v1321_v53 }
 0x755   :  { %v1911_v55 = vpop.eup %1910 }
 0x756   :  { %v1323_v56 = vmul.f32 %v1911_v55, %v1320_v54 }
 0x758   :  { %v1325_v58 = vmul.f32 %v1323_v56, %v1315_v47  ;;  %v1330_v59 = vrot.slane %v1323_v56, %v2327_v49 }
 0x75a   :  { %v1326_v60 = vsub.f32 %v1324_v57, %v1325_v58  ;;  %v1331_v61 = vmul.f32 %v1330_v59, %v1292_v28  ;;  %v1332_v62 = vmul.f32 %v1330_v59, %v1295_v30 }
 0x75c   :  { %v1336_v63 = vrot.slane %v1326_v60, %v2327_v49 }
 0x75e   :  { %v1337_v1 = vadd.f32 %v1336_v63, %v1331_v61  ;;  %v1338_v2 = vadd.f32 %v1336_v63, %v1332_v62 }
 0x760   :  { %v1340_v3 = vmax.f32 %v1338_v2, 0.0  ;;  %v1339_v4 = vmax.f32 %v1337_v1, 0.0 }
 0x762   :  { %v1341_v5 = vpack.c.bf16 %v1340_v3, %v1339_v4 }
 0x764   :  { %1807 = vmatmul.mubr.bf16.vlgmr.msra.gmra.mxu0 %v1341_v5 }
 0x824   :  { %v1445_v7 = vpop.f32.mrf.mxu0 }
 0x825   :  { %v1446_v8 = vadd.f32 %v1540_v6, %v1445_v7 }
 0x826   :  { %v1808_v9 = vpop.f32.mrf.mxu0 }
 0x827   :  { %1452 = vst [vmem:[#allocation17] sm:$0xff] %v1446_v8 }
 0x828   :  { %v1448_v10 = vpop.f32.mrf.mxu0 }
 0x829   :  { %v1449_v11 = vadd.f32 %v1540_v6, %v1448_v10 }
 0x82a   :  { %v1809_v49 = vpop.f32.mrf.mxu0 }
 0x82b   :  { %1453 = vst [vmem:[#allocation17 + $0x8] sm:$0xff] %v1449_v11 }
 0x82c   :  { %2103 = shalt.err (!%p2100_p7)
}
 0x82d   :  { %s2138_s4 = smov 128   ;;  %s2139_s18 = smov 8  }
 0x82e   :  { %1465 = dma.vmem_to_hbm [thread:$0]  %s1460_s25, 256, %s2482_s19, [#allocation4], %s2138_s4, %s2138_s4, %s2139_s18  }
 0x82f   :  { %2122 = dma.done.wait [#allocation4], 256  }
 0x830   :  { %2123 = vsyncadd [#allocation4], 4294967040 }
 0x831   :  { %1469 = vsyncpa [#allocation3], 1 }
 0x832   :  { %1470 = vsyncpa [#allocation6], 1 }
 0x833   :  { %1471 = vsyncpa [#allocation9], 1 }
 0x834   :  { %1472 = vsyncpa [#allocation12], 1 }
 0x835   :  { %1473 = vsyncpa [#allocation15], 1 }
 0x836   :  { %1474 = vsyncpa [#allocation4], 1 }

</bundles_post_ra>
